<compile_context>
chip_gen: v5e
topology: v5e:2x2
jax: 0.10.0
libtpu: 0.0.40
codegen_flags: <defaults>
</compile_context>

<pallas_src>
import functools

import jax
import jax.numpy as jnp
from jax.experimental import pallas as pl
from jax.experimental.pallas import tpu as pltpu


def _disc_q_kernel(x_ref, w1_ref, wf_ref, bmv_ref, bd_ref, mv_ref, disc_ref,
                   *, n_pos):
    """One batch tile.

    x_ref   : (n_pos, tmb, Cin)     bf16  position-major activations
    w1_ref  : (Cin, 128)            bf16  1x1 conv (no bias)
    wf_ref  : (n_pos, 128, 14)      bf16  fused [Q_mu|Q_var|Q_disc[p]] weights
    bmv_ref : (1, n_pos*4)          f32   packed mu|var bias (mu cols, var cols)
    bd_ref  : (1, 10)               f32   Q_disc bias
    mv_ref  : (tmb, n_pos*4)        f32   lane-dense packed mu|var output
    disc_ref: (tmb, 10)             f32   Q_disc output
    """
    tmb = x_ref.shape[1]
    cin = x_ref.shape[-1]

    # --- main 1x1 conv + ReLU: ONE big matmul over all positions ----------
    # (n_pos, tmb, cin) -> (n_pos*tmb, cin) is a free, tile-aligned reshape
    # because tmb is a multiple of 16 (bf16 sublane packing).
    x2d = x_ref[...].reshape(n_pos * tmb, cin)
    feat = jnp.maximum(
        jnp.dot(x2d, w1_ref[...], preferred_element_type=jnp.float32), 0.0)
    feat_b = feat.astype(jnp.bfloat16)                     # (n_pos*tmb, 128)

    # --- fused heads: one (tmb,128)@(128,14) matmul per spatial position ---
    # cols 0:2 -> mu, 2:4 -> var, 4:14 -> Q_disc (accumulated over positions).
    acc = jnp.zeros((tmb, 10), jnp.float32)
    mu_parts, var_parts = [], []
    for p in range(n_pos):                                  # static, unrolled
        fp = feat_b[p * tmb:(p + 1) * tmb, :]               # tile-aligned rows
        z = jnp.dot(fp, wf_ref[p], preferred_element_type=jnp.float32)
        mu_parts.append(z[:, 0:2])
        var_parts.append(z[:, 2:4])
        acc = acc + z[:, 4:14]

    # --- lane-dense mu|var output: [all mu cols | all var cols] -----------
    nmu = n_pos * 2
    bmv = bmv_ref[...]                                      # (1, n_pos*4)
    mu_cat = jnp.concatenate(mu_parts, axis=1) + bmv[:, :nmu]
    var_cat = jnp.exp(jnp.concatenate(var_parts, axis=1) + bmv[:, nmu:])
    mv_ref[...] = jnp.concatenate([mu_cat, var_cat], axis=1)

    disc_ref[...] = acc + bd_ref[...]


def _pick_tmb(n, min_tiles=4, max_tmb=128):
    """Batch rows per tile: a multiple of 16 (bf16 sublane packing), capped so
    VMEM stays bounded and there are >= min_tiles grid steps when the batch
    allows it (pipelined DMA overlap + v7x two-TensorCore sharding)."""
    t = -(-n // min_tiles)            # cdiv(n, min_tiles)
    t = ((t + 15) // 16) * 16         # round up to a multiple of 16
    return max(16, min(max_tmb, t))


def discriminator_q_forward(x_nchw, params):
    """x_nchw: (N, Cin, 4, 4) float32.  Returns (output, mu, var) like PyTorch."""
    n, cin, h, w = x_nchw.shape
    assert h == 4 and w == 4, "Q_disc uses a 4x4 'valid' conv -> spatial must be 4x4"
    n_pos = h * w

    w1, wmu, bmu, wvar, bvar, wdisc, bdisc = (
        params["w1"], params["wmu"], params["bmu"],
        params["wvar"], params["bvar"], params["wdisc"], params["bdisc"])
    hidden = w1.shape[0]              # conv out-channels (128)

    tmb = _pick_tmb(n)
    n_pad = pl.cdiv(n, tmb) * tmb
    grid = (n_pad // tmb,)

    # NCHW -> (H*W, N_pad, Cin): position-major tokens, channels on lanes.
    # Padded batch rows are zeros; their (finite) outputs are sliced off below.
    x3d = jnp.transpose(x_nchw, (2, 3, 0, 1)).reshape(n_pos, n, cin)
    if n_pad != n:
        x3d = jnp.pad(x3d, ((0, 0), (0, n_pad - n), (0, 0)))
    x3d = x3d.astype(jnp.bfloat16)

    # PyTorch conv weights (O, I, kh, kw) -> kernel layouts.
    w1_k = jnp.transpose(w1[:, :, 0, 0], (1, 0)).astype(jnp.bfloat16)      # (Cin,128)
    wmv = jnp.transpose(
        jnp.concatenate([wmu[:, :, 0, 0], wvar[:, :, 0, 0]], axis=0), (1, 0))  # (128,4)
    wd = jnp.transpose(wdisc, (2, 3, 1, 0)).reshape(n_pos, hidden, 10)      # (16,128,10)
    wf_k = jnp.concatenate(
        [jnp.broadcast_to(wmv[None], (n_pos, hidden, 4)), wd],
        axis=2).astype(jnp.bfloat16)                                        # (16,128,14)
    # mu|var bias, packed to match the lane-dense (tmb, n_pos*4) output.
    bmv_k = jnp.concatenate(
        [jnp.tile(bmu, n_pos), jnp.tile(bvar, n_pos)]
    ).reshape(1, n_pos * 4).astype(jnp.float32)                             # (1,64)
    bd_k = bdisc.reshape(1, 10).astype(jnp.float32)

    m = n_pad * n_pos
    cost = pl.CostEstimate(
        flops=2 * m * cin * hidden + 2 * m * hidden * 14,
        transcendentals=n_pad * n_pos * 2,
        bytes_accessed=int(x3d.size * 2 + w1_k.size * 2 + wf_k.size * 2
                           + bmv_k.size * 4 + bd_k.size * 4
                           + n_pad * (n_pos * 4 + 10) * 4),
    )

    mv, disc = pl.pallas_call(
        functools.partial(_disc_q_kernel, n_pos=n_pos),
        out_shape=(jax.ShapeDtypeStruct((n_pad, n_pos * 4), jnp.float32),
                   jax.ShapeDtypeStruct((n_pad, 10), jnp.float32)),
        grid=grid,
        in_specs=[
            pl.BlockSpec((n_pos, tmb, cin), lambda i: (0, i, 0)),   # activations
            pl.BlockSpec((cin, hidden), lambda i: (0, 0)),          # w1 (resident)
            pl.BlockSpec((n_pos, hidden, 14), lambda i: (0, 0, 0)),  # fused head W
            pl.BlockSpec((1, n_pos * 4), lambda i: (0, 0)),         # mu|var bias
            pl.BlockSpec((1, 10), lambda i: (0, 0)),                # disc bias
        ],
        out_specs=(
            pl.BlockSpec((tmb, n_pos * 4), lambda i: (i, 0)),       # packed mu|var
            pl.BlockSpec((tmb, 10), lambda i: (i, 0)),              # disc
        ),
        compiler_params=pltpu.CompilerParams(
            dimension_semantics=("parallel",),           # megacore / 2-TC sharding
            vmem_limit_bytes=32 * 1024 * 1024,           # safe on v5e/v6e/v7x
            allow_input_fusion=[True, False, False, False, False],
        ),
        cost_estimate=cost,
    )(x3d, w1_k, wf_k, bmv_k, bd_k)

    # Back to PyTorch output shapes.
    output = disc[:n].reshape(n, 10, 1, 1)                                  # (N,10,1,1)
    nmu = n_pos * 2
    mu = jnp.transpose(mv[:n, :nmu].reshape(n, n_pos, 2),
                       (0, 2, 1)).reshape(n, 2, h, w)                       # (N,2,4,4)
    var = jnp.transpose(mv[:n, nmu:].reshape(n, n_pos, 2),
                        (0, 2, 1)).reshape(n, 2, h, w)                      # (N,2,4,4)
    return output, mu, var


def init_params(key, cin, hidden=128):
    ks = jax.random.split(key, 7)
    s = 0.05
    return {
        "w1":    s * jax.random.normal(ks[0], (hidden, cin, 1, 1), jnp.float32),
        "wmu":   s * jax.random.normal(ks[1], (2, hidden, 1, 1), jnp.float32),
        "bmu":   s * jax.random.normal(ks[2], (2,), jnp.float32),
        "wvar":  s * jax.random.normal(ks[3], (2, hidden, 1, 1), jnp.float32),
        "bvar":  s * jax.random.normal(ks[4], (2,), jnp.float32),
        "wdisc": s * jax.random.normal(ks[5], (10, hidden, 4, 4), jnp.float32),
        "bdisc": s * jax.random.normal(ks[6], (10,), jnp.float32),
    }


def _reference_forward(x_nchw, params):
    # Plain-JAX f32 reference of the PyTorch semantics (verification only).
    n = x_nchw.shape[0]
    feat = jnp.einsum("nihw,oi->nohw", x_nchw, params["w1"][:, :, 0, 0])
    feat = jnp.maximum(feat, 0.0)
    mu = jnp.einsum("nihw,oi->nohw", feat, params["wmu"][:, :, 0, 0]) \
        + params["bmu"][None, :, None, None]
    var = jnp.exp(jnp.einsum("nihw,oi->nohw", feat, params["wvar"][:, :, 0, 0])
                  + params["bvar"][None, :, None, None])
    out = jnp.einsum("nihw,oihw->no", feat, params["wdisc"]) + params["bdisc"]
    return out.reshape(n, 10, 1, 1), mu, var


if __name__ == "__main__":
    # Module-consistent small shapes: ndf=4 -> Cin = ndf*8 = 32, spatial 4x4.
    N, NDF, H, W = 2, 4, 4, 4
    CIN = NDF * 8

    key = jax.random.PRNGKey(0)
    kx, kp = jax.random.split(key)
    x = jax.random.normal(kx, (N, CIN, H, W), jnp.float32)
    params = init_params(kp, CIN)

    out, mu, var = discriminator_q_forward(x, params)
    jax.block_until_ready((out, mu, var))

    ref_out, ref_mu, ref_var = _reference_forward(x, params)
    assert out.shape == (N, 10, 1, 1)
    assert mu.shape == (N, 2, H, W)
    assert var.shape == (N, 2, H, W)
    # bf16 matmul operands (f32 accumulation) -> compare to the f32 reference
    # with a correspondingly looser tolerance.
    assert jnp.allclose(out, ref_out, atol=3e-2, rtol=3e-2)
    assert jnp.allclose(mu, ref_mu, atol=3e-2, rtol=3e-2)
    assert jnp.allclose(var, ref_var, atol=3e-2, rtol=3e-2)

    print("KERNEL_OK")
</pallas_src>

<mosaic_0001>
module attributes {stable_mosaic.version = 11 : i64} {
  func.func @_disc_q_kernel(%arg0: i32, %arg1: memref<16x16x32xbf16, #tpu.memory_space<vmem>>, %arg2: memref<32x128xbf16, #tpu.memory_space<vmem>>, %arg3: memref<16x128x14xbf16, #tpu.memory_space<vmem>>, %arg4: memref<1x64xf32, #tpu.memory_space<vmem>>, %arg5: memref<1x10xf32, #tpu.memory_space<vmem>>, %arg6: memref<16x64xf32, #tpu.memory_space<vmem>>, %arg7: memref<16x10xf32, #tpu.memory_space<vmem>>) attributes {dimension_semantics = [#tpu.dimension_semantics<parallel>], iteration_bounds = array<i64: 1>, scalar_prefetch = 0 : i64, scratch_operands = 0 : i64, tpu.core_type = #tpu.core_type<tc>, window_params = [{transform_indices = @transform_0, window_bounds = array<i64: 16, 16, 32>}, {pipeline_mode = #tpu.pipeline_mode<synchronous>, transform_indices = @transform_1, window_bounds = array<i64: 32, 128>}, {pipeline_mode = #tpu.pipeline_mode<synchronous>, transform_indices = @transform_2, window_bounds = array<i64: 16, 128, 14>}, {pipeline_mode = #tpu.pipeline_mode<synchronous>, transform_indices = @transform_3, window_bounds = array<i64: 1, 64>}, {pipeline_mode = #tpu.pipeline_mode<synchronous>, transform_indices = @transform_4, window_bounds = array<i64: 1, 10>}, {transform_indices = @transform_5, window_bounds = array<i64: 16, 64>}, {transform_indices = @transform_6, window_bounds = array<i64: 16, 10>}]} {
    %c0 = arith.constant 0 : index
    %c0_0 = arith.constant 0 : index
    %c0_1 = arith.constant 0 : index
    %0 = vector.load %arg1[%c0, %c0_0, %c0_1] : memref<16x16x32xbf16, #tpu.memory_space<vmem>>, vector<16x16x32xbf16>
    %1 = vector.shape_cast %0 : vector<16x16x32xbf16> to vector<256x32xbf16>
    %c0_2 = arith.constant 0 : index
    %c0_3 = arith.constant 0 : index
    %2 = vector.load %arg2[%c0_2, %c0_3] : memref<32x128xbf16, #tpu.memory_space<vmem>>, vector<32x128xbf16>
    %cst = arith.constant dense<0.000000e+00> : vector<256x128xf32>
    %3 = tpu.matmul %1, %2, %cst {dimension_numbers = #tpu.dot_dimension_numbers<[1], [0], [0], [1], [0, 0, 1, 1], [], []>} : vector<256x32xbf16>, vector<32x128xbf16>, vector<256x128xf32> -> vector<256x128xf32>
    %cst_4 = arith.constant 0.000000e+00 : f32
    %4 = vector.broadcast %cst_4 : f32 to vector<256x128xf32>
    %5 = arith.maximumf %3, %4 : vector<256x128xf32>
    %6 = arith.truncf %5 : vector<256x128xf32> to vector<256x128xbf16>
    %cst_5 = arith.constant 0.000000e+00 : f32
    %7 = vector.broadcast %cst_5 : f32 to vector<16x10xf32>
    %8 = vector.extract_strided_slice %6 {offsets = [0, 0], sizes = [16, 128], strides = [1, 1]} : vector<256x128xbf16> to vector<16x128xbf16>
    %c0_6 = arith.constant 0 : index
    %c0_7 = arith.constant 0 : index
    %c0_8 = arith.constant 0 : index
    %9 = vector.load %arg3[%c0_6, %c0_7, %c0_8] : memref<16x128x14xbf16, #tpu.memory_space<vmem>>, vector<1x128x14xbf16>
    %10 = vector.shape_cast %9 : vector<1x128x14xbf16> to vector<128x14xbf16>
    %cst_9 = arith.constant dense<0.000000e+00> : vector<16x14xf32>
    %11 = tpu.matmul %8, %10, %cst_9 {dimension_numbers = #tpu.dot_dimension_numbers<[1], [0], [0], [1], [0, 0, 1, 1], [], []>} : vector<16x128xbf16>, vector<128x14xbf16>, vector<16x14xf32> -> vector<16x14xf32>
    %12 = vector.extract_strided_slice %11 {offsets = [0, 0], sizes = [16, 2], strides = [1, 1]} : vector<16x14xf32> to vector<16x2xf32>
    %13 = vector.extract_strided_slice %11 {offsets = [0, 2], sizes = [16, 2], strides = [1, 1]} : vector<16x14xf32> to vector<16x2xf32>
    %14 = vector.extract_strided_slice %11 {offsets = [0, 4], sizes = [16, 10], strides = [1, 1]} : vector<16x14xf32> to vector<16x10xf32>
    %15 = arith.addf %7, %14 : vector<16x10xf32>
    %16 = vector.extract_strided_slice %6 {offsets = [16, 0], sizes = [16, 128], strides = [1, 1]} : vector<256x128xbf16> to vector<16x128xbf16>
    %c1 = arith.constant 1 : index
    %c0_10 = arith.constant 0 : index
    %c0_11 = arith.constant 0 : index
    %17 = vector.load %arg3[%c1, %c0_10, %c0_11] : memref<16x128x14xbf16, #tpu.memory_space<vmem>>, vector<1x128x14xbf16>
    %18 = vector.shape_cast %17 : vector<1x128x14xbf16> to vector<128x14xbf16>
    %cst_12 = arith.constant dense<0.000000e+00> : vector<16x14xf32>
    %19 = tpu.matmul %16, %18, %cst_12 {dimension_numbers = #tpu.dot_dimension_numbers<[1], [0], [0], [1], [0, 0, 1, 1], [], []>} : vector<16x128xbf16>, vector<128x14xbf16>, vector<16x14xf32> -> vector<16x14xf32>
    %20 = vector.extract_strided_slice %19 {offsets = [0, 0], sizes = [16, 2], strides = [1, 1]} : vector<16x14xf32> to vector<16x2xf32>
    %21 = vector.extract_strided_slice %19 {offsets = [0, 2], sizes = [16, 2], strides = [1, 1]} : vector<16x14xf32> to vector<16x2xf32>
    %22 = vector.extract_strided_slice %19 {offsets = [0, 4], sizes = [16, 10], strides = [1, 1]} : vector<16x14xf32> to vector<16x10xf32>
    %23 = arith.addf %15, %22 : vector<16x10xf32>
    %24 = vector.extract_strided_slice %6 {offsets = [32, 0], sizes = [16, 128], strides = [1, 1]} : vector<256x128xbf16> to vector<16x128xbf16>
    %c2 = arith.constant 2 : index
    %c0_13 = arith.constant 0 : index
    %c0_14 = arith.constant 0 : index
    %25 = vector.load %arg3[%c2, %c0_13, %c0_14] : memref<16x128x14xbf16, #tpu.memory_space<vmem>>, vector<1x128x14xbf16>
    %26 = vector.shape_cast %25 : vector<1x128x14xbf16> to vector<128x14xbf16>
    %cst_15 = arith.constant dense<0.000000e+00> : vector<16x14xf32>
    %27 = tpu.matmul %24, %26, %cst_15 {dimension_numbers = #tpu.dot_dimension_numbers<[1], [0], [0], [1], [0, 0, 1, 1], [], []>} : vector<16x128xbf16>, vector<128x14xbf16>, vector<16x14xf32> -> vector<16x14xf32>
    %28 = vector.extract_strided_slice %27 {offsets = [0, 0], sizes = [16, 2], strides = [1, 1]} : vector<16x14xf32> to vector<16x2xf32>
    %29 = vector.extract_strided_slice %27 {offsets = [0, 2], sizes = [16, 2], strides = [1, 1]} : vector<16x14xf32> to vector<16x2xf32>
    %30 = vector.extract_strided_slice %27 {offsets = [0, 4], sizes = [16, 10], strides = [1, 1]} : vector<16x14xf32> to vector<16x10xf32>
    %31 = arith.addf %23, %30 : vector<16x10xf32>
    %32 = vector.extract_strided_slice %6 {offsets = [48, 0], sizes = [16, 128], strides = [1, 1]} : vector<256x128xbf16> to vector<16x128xbf16>
    %c3 = arith.constant 3 : index
    %c0_16 = arith.constant 0 : index
    %c0_17 = arith.constant 0 : index
    %33 = vector.load %arg3[%c3, %c0_16, %c0_17] : memref<16x128x14xbf16, #tpu.memory_space<vmem>>, vector<1x128x14xbf16>
    %34 = vector.shape_cast %33 : vector<1x128x14xbf16> to vector<128x14xbf16>
    %cst_18 = arith.constant dense<0.000000e+00> : vector<16x14xf32>
    %35 = tpu.matmul %32, %34, %cst_18 {dimension_numbers = #tpu.dot_dimension_numbers<[1], [0], [0], [1], [0, 0, 1, 1], [], []>} : vector<16x128xbf16>, vector<128x14xbf16>, vector<16x14xf32> -> vector<16x14xf32>
    %36 = vector.extract_strided_slice %35 {offsets = [0, 0], sizes = [16, 2], strides = [1, 1]} : vector<16x14xf32> to vector<16x2xf32>
    %37 = vector.extract_strided_slice %35 {offsets = [0, 2], sizes = [16, 2], strides = [1, 1]} : vector<16x14xf32> to vector<16x2xf32>
    %38 = vector.extract_strided_slice %35 {offsets = [0, 4], sizes = [16, 10], strides = [1, 1]} : vector<16x14xf32> to vector<16x10xf32>
    %39 = arith.addf %31, %38 : vector<16x10xf32>
    %40 = vector.extract_strided_slice %6 {offsets = [64, 0], sizes = [16, 128], strides = [1, 1]} : vector<256x128xbf16> to vector<16x128xbf16>
    %c4 = arith.constant 4 : index
    %c0_19 = arith.constant 0 : index
    %c0_20 = arith.constant 0 : index
    %41 = vector.load %arg3[%c4, %c0_19, %c0_20] : memref<16x128x14xbf16, #tpu.memory_space<vmem>>, vector<1x128x14xbf16>
    %42 = vector.shape_cast %41 : vector<1x128x14xbf16> to vector<128x14xbf16>
    %cst_21 = arith.constant dense<0.000000e+00> : vector<16x14xf32>
    %43 = tpu.matmul %40, %42, %cst_21 {dimension_numbers = #tpu.dot_dimension_numbers<[1], [0], [0], [1], [0, 0, 1, 1], [], []>} : vector<16x128xbf16>, vector<128x14xbf16>, vector<16x14xf32> -> vector<16x14xf32>
    %44 = vector.extract_strided_slice %43 {offsets = [0, 0], sizes = [16, 2], strides = [1, 1]} : vector<16x14xf32> to vector<16x2xf32>
    %45 = vector.extract_strided_slice %43 {offsets = [0, 2], sizes = [16, 2], strides = [1, 1]} : vector<16x14xf32> to vector<16x2xf32>
    %46 = vector.extract_strided_slice %43 {offsets = [0, 4], sizes = [16, 10], strides = [1, 1]} : vector<16x14xf32> to vector<16x10xf32>
    %47 = arith.addf %39, %46 : vector<16x10xf32>
    %48 = vector.extract_strided_slice %6 {offsets = [80, 0], sizes = [16, 128], strides = [1, 1]} : vector<256x128xbf16> to vector<16x128xbf16>
    %c5 = arith.constant 5 : index
    %c0_22 = arith.constant 0 : index
    %c0_23 = arith.constant 0 : index
    %49 = vector.load %arg3[%c5, %c0_22, %c0_23] : memref<16x128x14xbf16, #tpu.memory_space<vmem>>, vector<1x128x14xbf16>
    %50 = vector.shape_cast %49 : vector<1x128x14xbf16> to vector<128x14xbf16>
    %cst_24 = arith.constant dense<0.000000e+00> : vector<16x14xf32>
    %51 = tpu.matmul %48, %50, %cst_24 {dimension_numbers = #tpu.dot_dimension_numbers<[1], [0], [0], [1], [0, 0, 1, 1], [], []>} : vector<16x128xbf16>, vector<128x14xbf16>, vector<16x14xf32> -> vector<16x14xf32>
    %52 = vector.extract_strided_slice %51 {offsets = [0, 0], sizes = [16, 2], strides = [1, 1]} : vector<16x14xf32> to vector<16x2xf32>
    %53 = vector.extract_strided_slice %51 {offsets = [0, 2], sizes = [16, 2], strides = [1, 1]} : vector<16x14xf32> to vector<16x2xf32>
    %54 = vector.extract_strided_slice %51 {offsets = [0, 4], sizes = [16, 10], strides = [1, 1]} : vector<16x14xf32> to vector<16x10xf32>
    %55 = arith.addf %47, %54 : vector<16x10xf32>
    %56 = vector.extract_strided_slice %6 {offsets = [96, 0], sizes = [16, 128], strides = [1, 1]} : vector<256x128xbf16> to vector<16x128xbf16>
    %c6 = arith.constant 6 : index
    %c0_25 = arith.constant 0 : index
    %c0_26 = arith.constant 0 : index
    %57 = vector.load %arg3[%c6, %c0_25, %c0_26] : memref<16x128x14xbf16, #tpu.memory_space<vmem>>, vector<1x128x14xbf16>
    %58 = vector.shape_cast %57 : vector<1x128x14xbf16> to vector<128x14xbf16>
    %cst_27 = arith.constant dense<0.000000e+00> : vector<16x14xf32>
    %59 = tpu.matmul %56, %58, %cst_27 {dimension_numbers = #tpu.dot_dimension_numbers<[1], [0], [0], [1], [0, 0, 1, 1], [], []>} : vector<16x128xbf16>, vector<128x14xbf16>, vector<16x14xf32> -> vector<16x14xf32>
    %60 = vector.extract_strided_slice %59 {offsets = [0, 0], sizes = [16, 2], strides = [1, 1]} : vector<16x14xf32> to vector<16x2xf32>
    %61 = vector.extract_strided_slice %59 {offsets = [0, 2], sizes = [16, 2], strides = [1, 1]} : vector<16x14xf32> to vector<16x2xf32>
    %62 = vector.extract_strided_slice %59 {offsets = [0, 4], sizes = [16, 10], strides = [1, 1]} : vector<16x14xf32> to vector<16x10xf32>
    %63 = arith.addf %55, %62 : vector<16x10xf32>
    %64 = vector.extract_strided_slice %6 {offsets = [112, 0], sizes = [16, 128], strides = [1, 1]} : vector<256x128xbf16> to vector<16x128xbf16>
    %c7 = arith.constant 7 : index
    %c0_28 = arith.constant 0 : index
    %c0_29 = arith.constant 0 : index
    %65 = vector.load %arg3[%c7, %c0_28, %c0_29] : memref<16x128x14xbf16, #tpu.memory_space<vmem>>, vector<1x128x14xbf16>
    %66 = vector.shape_cast %65 : vector<1x128x14xbf16> to vector<128x14xbf16>
    %cst_30 = arith.constant dense<0.000000e+00> : vector<16x14xf32>
    %67 = tpu.matmul %64, %66, %cst_30 {dimension_numbers = #tpu.dot_dimension_numbers<[1], [0], [0], [1], [0, 0, 1, 1], [], []>} : vector<16x128xbf16>, vector<128x14xbf16>, vector<16x14xf32> -> vector<16x14xf32>
    %68 = vector.extract_strided_slice %67 {offsets = [0, 0], sizes = [16, 2], strides = [1, 1]} : vector<16x14xf32> to vector<16x2xf32>
    %69 = vector.extract_strided_slice %67 {offsets = [0, 2], sizes = [16, 2], strides = [1, 1]} : vector<16x14xf32> to vector<16x2xf32>
    %70 = vector.extract_strided_slice %67 {offsets = [0, 4], sizes = [16, 10], strides = [1, 1]} : vector<16x14xf32> to vector<16x10xf32>
    %71 = arith.addf %63, %70 : vector<16x10xf32>
    %72 = vector.extract_strided_slice %6 {offsets = [128, 0], sizes = [16, 128], strides = [1, 1]} : vector<256x128xbf16> to vector<16x128xbf16>
    %c8 = arith.constant 8 : index
    %c0_31 = arith.constant 0 : index
    %c0_32 = arith.constant 0 : index
    %73 = vector.load %arg3[%c8, %c0_31, %c0_32] : memref<16x128x14xbf16, #tpu.memory_space<vmem>>, vector<1x128x14xbf16>
    %74 = vector.shape_cast %73 : vector<1x128x14xbf16> to vector<128x14xbf16>
    %cst_33 = arith.constant dense<0.000000e+00> : vector<16x14xf32>
    %75 = tpu.matmul %72, %74, %cst_33 {dimension_numbers = #tpu.dot_dimension_numbers<[1], [0], [0], [1], [0, 0, 1, 1], [], []>} : vector<16x128xbf16>, vector<128x14xbf16>, vector<16x14xf32> -> vector<16x14xf32>
    %76 = vector.extract_strided_slice %75 {offsets = [0, 0], sizes = [16, 2], strides = [1, 1]} : vector<16x14xf32> to vector<16x2xf32>
    %77 = vector.extract_strided_slice %75 {offsets = [0, 2], sizes = [16, 2], strides = [1, 1]} : vector<16x14xf32> to vector<16x2xf32>
    %78 = vector.extract_strided_slice %75 {offsets = [0, 4], sizes = [16, 10], strides = [1, 1]} : vector<16x14xf32> to vector<16x10xf32>
    %79 = arith.addf %71, %78 : vector<16x10xf32>
    %80 = vector.extract_strided_slice %6 {offsets = [144, 0], sizes = [16, 128], strides = [1, 1]} : vector<256x128xbf16> to vector<16x128xbf16>
    %c9 = arith.constant 9 : index
    %c0_34 = arith.constant 0 : index
    %c0_35 = arith.constant 0 : index
    %81 = vector.load %arg3[%c9, %c0_34, %c0_35] : memref<16x128x14xbf16, #tpu.memory_space<vmem>>, vector<1x128x14xbf16>
    %82 = vector.shape_cast %81 : vector<1x128x14xbf16> to vector<128x14xbf16>
    %cst_36 = arith.constant dense<0.000000e+00> : vector<16x14xf32>
    %83 = tpu.matmul %80, %82, %cst_36 {dimension_numbers = #tpu.dot_dimension_numbers<[1], [0], [0], [1], [0, 0, 1, 1], [], []>} : vector<16x128xbf16>, vector<128x14xbf16>, vector<16x14xf32> -> vector<16x14xf32>
    %84 = vector.extract_strided_slice %83 {offsets = [0, 0], sizes = [16, 2], strides = [1, 1]} : vector<16x14xf32> to vector<16x2xf32>
    %85 = vector.extract_strided_slice %83 {offsets = [0, 2], sizes = [16, 2], strides = [1, 1]} : vector<16x14xf32> to vector<16x2xf32>
    %86 = vector.extract_strided_slice %83 {offsets = [0, 4], sizes = [16, 10], strides = [1, 1]} : vector<16x14xf32> to vector<16x10xf32>
    %87 = arith.addf %79, %86 : vector<16x10xf32>
    %88 = vector.extract_strided_slice %6 {offsets = [160, 0], sizes = [16, 128], strides = [1, 1]} : vector<256x128xbf16> to vector<16x128xbf16>
    %c10 = arith.constant 10 : index
    %c0_37 = arith.constant 0 : index
    %c0_38 = arith.constant 0 : index
    %89 = vector.load %arg3[%c10, %c0_37, %c0_38] : memref<16x128x14xbf16, #tpu.memory_space<vmem>>, vector<1x128x14xbf16>
    %90 = vector.shape_cast %89 : vector<1x128x14xbf16> to vector<128x14xbf16>
    %cst_39 = arith.constant dense<0.000000e+00> : vector<16x14xf32>
    %91 = tpu.matmul %88, %90, %cst_39 {dimension_numbers = #tpu.dot_dimension_numbers<[1], [0], [0], [1], [0, 0, 1, 1], [], []>} : vector<16x128xbf16>, vector<128x14xbf16>, vector<16x14xf32> -> vector<16x14xf32>
    %92 = vector.extract_strided_slice %91 {offsets = [0, 0], sizes = [16, 2], strides = [1, 1]} : vector<16x14xf32> to vector<16x2xf32>
    %93 = vector.extract_strided_slice %91 {offsets = [0, 2], sizes = [16, 2], strides = [1, 1]} : vector<16x14xf32> to vector<16x2xf32>
    %94 = vector.extract_strided_slice %91 {offsets = [0, 4], sizes = [16, 10], strides = [1, 1]} : vector<16x14xf32> to vector<16x10xf32>
    %95 = arith.addf %87, %94 : vector<16x10xf32>
    %96 = vector.extract_strided_slice %6 {offsets = [176, 0], sizes = [16, 128], strides = [1, 1]} : vector<256x128xbf16> to vector<16x128xbf16>
    %c11 = arith.constant 11 : index
    %c0_40 = arith.constant 0 : index
    %c0_41 = arith.constant 0 : index
    %97 = vector.load %arg3[%c11, %c0_40, %c0_41] : memref<16x128x14xbf16, #tpu.memory_space<vmem>>, vector<1x128x14xbf16>
    %98 = vector.shape_cast %97 : vector<1x128x14xbf16> to vector<128x14xbf16>
    %cst_42 = arith.constant dense<0.000000e+00> : vector<16x14xf32>
    %99 = tpu.matmul %96, %98, %cst_42 {dimension_numbers = #tpu.dot_dimension_numbers<[1], [0], [0], [1], [0, 0, 1, 1], [], []>} : vector<16x128xbf16>, vector<128x14xbf16>, vector<16x14xf32> -> vector<16x14xf32>
    %100 = vector.extract_strided_slice %99 {offsets = [0, 0], sizes = [16, 2], strides = [1, 1]} : vector<16x14xf32> to vector<16x2xf32>
    %101 = vector.extract_strided_slice %99 {offsets = [0, 2], sizes = [16, 2], strides = [1, 1]} : vector<16x14xf32> to vector<16x2xf32>
    %102 = vector.extract_strided_slice %99 {offsets = [0, 4], sizes = [16, 10], strides = [1, 1]} : vector<16x14xf32> to vector<16x10xf32>
    %103 = arith.addf %95, %102 : vector<16x10xf32>
    %104 = vector.extract_strided_slice %6 {offsets = [192, 0], sizes = [16, 128], strides = [1, 1]} : vector<256x128xbf16> to vector<16x128xbf16>
    %c12 = arith.constant 12 : index
    %c0_43 = arith.constant 0 : index
    %c0_44 = arith.constant 0 : index
    %105 = vector.load %arg3[%c12, %c0_43, %c0_44] : memref<16x128x14xbf16, #tpu.memory_space<vmem>>, vector<1x128x14xbf16>
    %106 = vector.shape_cast %105 : vector<1x128x14xbf16> to vector<128x14xbf16>
    %cst_45 = arith.constant dense<0.000000e+00> : vector<16x14xf32>
    %107 = tpu.matmul %104, %106, %cst_45 {dimension_numbers = #tpu.dot_dimension_numbers<[1], [0], [0], [1], [0, 0, 1, 1], [], []>} : vector<16x128xbf16>, vector<128x14xbf16>, vector<16x14xf32> -> vector<16x14xf32>
    %108 = vector.extract_strided_slice %107 {offsets = [0, 0], sizes = [16, 2], strides = [1, 1]} : vector<16x14xf32> to vector<16x2xf32>
    %109 = vector.extract_strided_slice %107 {offsets = [0, 2], sizes = [16, 2], strides = [1, 1]} : vector<16x14xf32> to vector<16x2xf32>
    %110 = vector.extract_strided_slice %107 {offsets = [0, 4], sizes = [16, 10], strides = [1, 1]} : vector<16x14xf32> to vector<16x10xf32>
    %111 = arith.addf %103, %110 : vector<16x10xf32>
    %112 = vector.extract_strided_slice %6 {offsets = [208, 0], sizes = [16, 128], strides = [1, 1]} : vector<256x128xbf16> to vector<16x128xbf16>
    %c13 = arith.constant 13 : index
    %c0_46 = arith.constant 0 : index
    %c0_47 = arith.constant 0 : index
    %113 = vector.load %arg3[%c13, %c0_46, %c0_47] : memref<16x128x14xbf16, #tpu.memory_space<vmem>>, vector<1x128x14xbf16>
    %114 = vector.shape_cast %113 : vector<1x128x14xbf16> to vector<128x14xbf16>
    %cst_48 = arith.constant dense<0.000000e+00> : vector<16x14xf32>
    %115 = tpu.matmul %112, %114, %cst_48 {dimension_numbers = #tpu.dot_dimension_numbers<[1], [0], [0], [1], [0, 0, 1, 1], [], []>} : vector<16x128xbf16>, vector<128x14xbf16>, vector<16x14xf32> -> vector<16x14xf32>
    %116 = vector.extract_strided_slice %115 {offsets = [0, 0], sizes = [16, 2], strides = [1, 1]} : vector<16x14xf32> to vector<16x2xf32>
    %117 = vector.extract_strided_slice %115 {offsets = [0, 2], sizes = [16, 2], strides = [1, 1]} : vector<16x14xf32> to vector<16x2xf32>
    %118 = vector.extract_strided_slice %115 {offsets = [0, 4], sizes = [16, 10], strides = [1, 1]} : vector<16x14xf32> to vector<16x10xf32>
    %119 = arith.addf %111, %118 : vector<16x10xf32>
    %120 = vector.extract_strided_slice %6 {offsets = [224, 0], sizes = [16, 128], strides = [1, 1]} : vector<256x128xbf16> to vector<16x128xbf16>
    %c14 = arith.constant 14 : index
    %c0_49 = arith.constant 0 : index
    %c0_50 = arith.constant 0 : index
    %121 = vector.load %arg3[%c14, %c0_49, %c0_50] : memref<16x128x14xbf16, #tpu.memory_space<vmem>>, vector<1x128x14xbf16>
    %122 = vector.shape_cast %121 : vector<1x128x14xbf16> to vector<128x14xbf16>
    %cst_51 = arith.constant dense<0.000000e+00> : vector<16x14xf32>
    %123 = tpu.matmul %120, %122, %cst_51 {dimension_numbers = #tpu.dot_dimension_numbers<[1], [0], [0], [1], [0, 0, 1, 1], [], []>} : vector<16x128xbf16>, vector<128x14xbf16>, vector<16x14xf32> -> vector<16x14xf32>
    %124 = vector.extract_strided_slice %123 {offsets = [0, 0], sizes = [16, 2], strides = [1, 1]} : vector<16x14xf32> to vector<16x2xf32>
    %125 = vector.extract_strided_slice %123 {offsets = [0, 2], sizes = [16, 2], strides = [1, 1]} : vector<16x14xf32> to vector<16x2xf32>
    %126 = vector.extract_strided_slice %123 {offsets = [0, 4], sizes = [16, 10], strides = [1, 1]} : vector<16x14xf32> to vector<16x10xf32>
    %127 = arith.addf %119, %126 : vector<16x10xf32>
    %128 = vector.extract_strided_slice %6 {offsets = [240, 0], sizes = [16, 128], strides = [1, 1]} : vector<256x128xbf16> to vector<16x128xbf16>
    %c15 = arith.constant 15 : index
    %c0_52 = arith.constant 0 : index
    %c0_53 = arith.constant 0 : index
    %129 = vector.load %arg3[%c15, %c0_52, %c0_53] : memref<16x128x14xbf16, #tpu.memory_space<vmem>>, vector<1x128x14xbf16>
    %130 = vector.shape_cast %129 : vector<1x128x14xbf16> to vector<128x14xbf16>
    %cst_54 = arith.constant dense<0.000000e+00> : vector<16x14xf32>
    %131 = tpu.matmul %128, %130, %cst_54 {dimension_numbers = #tpu.dot_dimension_numbers<[1], [0], [0], [1], [0, 0, 1, 1], [], []>} : vector<16x128xbf16>, vector<128x14xbf16>, vector<16x14xf32> -> vector<16x14xf32>
    %132 = vector.extract_strided_slice %131 {offsets = [0, 0], sizes = [16, 2], strides = [1, 1]} : vector<16x14xf32> to vector<16x2xf32>
    %133 = vector.extract_strided_slice %131 {offsets = [0, 2], sizes = [16, 2], strides = [1, 1]} : vector<16x14xf32> to vector<16x2xf32>
    %134 = vector.extract_strided_slice %131 {offsets = [0, 4], sizes = [16, 10], strides = [1, 1]} : vector<16x14xf32> to vector<16x10xf32>
    %135 = arith.addf %127, %134 : vector<16x10xf32>
    %c0_55 = arith.constant 0 : index
    %c0_56 = arith.constant 0 : index
    %136 = vector.load %arg4[%c0_55, %c0_56] : memref<1x64xf32, #tpu.memory_space<vmem>>, vector<1x64xf32>
    %137 = tpu.concatenate %12, %20, %28, %36, %44, %52, %60, %68, %76, %84, %92, %100, %108, %116, %124, %132 in 1 : vector<16x2xf32>, vector<16x2xf32>, vector<16x2xf32>, vector<16x2xf32>, vector<16x2xf32>, vector<16x2xf32>, vector<16x2xf32>, vector<16x2xf32>, vector<16x2xf32>, vector<16x2xf32>, vector<16x2xf32>, vector<16x2xf32>, vector<16x2xf32>, vector<16x2xf32>, vector<16x2xf32>, vector<16x2xf32> -> vector<16x32xf32>
    %138 = vector.extract_strided_slice %136 {offsets = [0, 0], sizes = [1, 32], strides = [1, 1]} : vector<1x64xf32> to vector<1x32xf32>
    %139 = vector.broadcast %138 : vector<1x32xf32> to vector<16x32xf32>
    %140 = arith.addf %137, %139 : vector<16x32xf32>
    %141 = tpu.concatenate %13, %21, %29, %37, %45, %53, %61, %69, %77, %85, %93, %101, %109, %117, %125, %133 in 1 : vector<16x2xf32>, vector<16x2xf32>, vector<16x2xf32>, vector<16x2xf32>, vector<16x2xf32>, vector<16x2xf32>, vector<16x2xf32>, vector<16x2xf32>, vector<16x2xf32>, vector<16x2xf32>, vector<16x2xf32>, vector<16x2xf32>, vector<16x2xf32>, vector<16x2xf32>, vector<16x2xf32>, vector<16x2xf32> -> vector<16x32xf32>
    %142 = vector.extract_strided_slice %136 {offsets = [0, 32], sizes = [1, 32], strides = [1, 1]} : vector<1x64xf32> to vector<1x32xf32>
    %143 = vector.broadcast %142 : vector<1x32xf32> to vector<16x32xf32>
    %144 = arith.addf %141, %143 : vector<16x32xf32>
    %145 = math.exp %144 : vector<16x32xf32>
    %146 = tpu.concatenate %140, %145 in 1 : vector<16x32xf32>, vector<16x32xf32> -> vector<16x64xf32>
    %c0_57 = arith.constant 0 : index
    %c0_58 = arith.constant 0 : index
    %147 = vector.load %arg6[%c0_57, %c0_58] : memref<16x64xf32, #tpu.memory_space<vmem>>, vector<16x64xf32>
    tpu.vector_store %arg6[%c0_57, %c0_58], %146 {strides = array<i32>} : memref<16x64xf32, #tpu.memory_space<vmem>>, vector<16x64xf32>,
    %c0_59 = arith.constant 0 : index
    %c0_60 = arith.constant 0 : index
    %148 = vector.load %arg5[%c0_59, %c0_60] : memref<1x10xf32, #tpu.memory_space<vmem>>, vector<1x10xf32>
    %149 = vector.broadcast %148 : vector<1x10xf32> to vector<16x10xf32>
    %150 = arith.addf %135, %149 : vector<16x10xf32>
    %c0_61 = arith.constant 0 : index
    %c0_62 = arith.constant 0 : index
    %151 = vector.load %arg7[%c0_61, %c0_62] : memref<16x10xf32, #tpu.memory_space<vmem>>, vector<16x10xf32>
    tpu.vector_store %arg7[%c0_61, %c0_62], %150 {strides = array<i32>} : memref<16x10xf32, #tpu.memory_space<vmem>>, vector<16x10xf32>,
    return
  }
  func.func @transform_0(%arg0: i32) -> (i32, i32, i32) {
    %c0_i32 = arith.constant 0 : i32
    %c0_i32_0 = arith.constant 0 : i32
    %c0_i32_1 = arith.constant 0 : i32
    return %c0_i32, %arg0, %c0_i32_0 : i32, i32, i32
  }
  func.func @transform_1(%arg0: i32) -> (i32, i32) {
    %c0_i32 = arith.constant 0 : i32
    %c0_i32_0 = arith.constant 0 : i32
    %c0_i32_1 = arith.constant 0 : i32
    return %c0_i32, %c0_i32_0 : i32, i32
  }
  func.func @transform_2(%arg0: i32) -> (i32, i32, i32) {
    %c0_i32 = arith.constant 0 : i32
    %c0_i32_0 = arith.constant 0 : i32
    %c0_i32_1 = arith.constant 0 : i32
    %c0_i32_2 = arith.constant 0 : i32
    return %c0_i32, %c0_i32_0, %c0_i32_1 : i32, i32, i32
  }
  func.func @transform_3(%arg0: i32) -> (i32, i32) {
    %c0_i32 = arith.constant 0 : i32
    %c0_i32_0 = arith.constant 0 : i32
    %c0_i32_1 = arith.constant 0 : i32
    return %c0_i32, %c0_i32_0 : i32, i32
  }
  func.func @transform_4(%arg0: i32) -> (i32, i32) {
    %c0_i32 = arith.constant 0 : i32
    %c0_i32_0 = arith.constant 0 : i32
    %c0_i32_1 = arith.constant 0 : i32
    return %c0_i32, %c0_i32_0 : i32, i32
  }
  func.func @transform_5(%arg0: i32) -> (i32, i32) {
    %c0_i32 = arith.constant 0 : i32
    %c0_i32_0 = arith.constant 0 : i32
    return %arg0, %c0_i32 : i32, i32
  }
  func.func @transform_6(%arg0: i32) -> (i32, i32) {
    %c0_i32 = arith.constant 0 : i32
    %c0_i32_0 = arith.constant 0 : i32
    return %arg0, %c0_i32 : i32, i32
  }
}

</mosaic_0001>

<bundles_post_ra>
// kernel: tpu_custom_call.1
= control target key start
LH: loop header
LB: loop body
LE: loop exit
PB: predicated region body
PF: predicated region fallthrough
CT: control target
= control target key end

     0   :  { %12 = vsyncpa [#allocation3], 0  ;;  %s3858_s0 = inlined_call_operand.vmem [shape: bf16[16,16,32], index: 0, kind: input, shape index: {}]   ;;  %s3859_s1 = inlined_call_operand.vmem [shape: bf16[32,128], index: 1, kind: input, shape index: {}]   ;;  %s3860_s2 = inlined_call_operand.vmem [shape: bf16[16,128,14], index: 2, kind: input, shape index: {}]   ;;  %s3861_s3 = inlined_call_operand.vmem [shape: f32[1,64], index: 3, kind: input, shape index: {}]   ;;  %s3862_s4 = inlined_call_operand.vmem [shape: f32[1,10], index: 4, kind: input, shape index: {}]   ;;  %s3863_s5 = inlined_call_operand.hbm [shape: f32[16,64], index: 5, kind: output, shape index: {0}]   ;;  %s3864_s6 = inlined_call_operand.hbm [shape: f32[16,10], index: 6, kind: output, shape index: {1}]  }
   0x1   :  { %v2972_v0 = vld [vmem:[%s3859_s1 + $0x8] sm:$0xff]  ;;  %v2971_v1 = vld [vmem:[%s3859_s1] sm:$0xff] }
   0x2   :  { %208 = vmatpush.bf16.msra.mxu0 %v2972_v0  ;;  %3101 = vmatpush.bf16.msra.mxu2 %v2972_v0 }
   0x3   :  { %13 = vsyncpa [#allocation5], 0  ;;  %3102 = vmatpush.bf16.msra.mxu3 %v2972_v0  ;;  %v2955_v2 = vld [vmem:[%s3858_s0] sm:$0xff]  ;;  %vm153_vm0 = vcmask 261120   ;;  %v2956_v3 = vld [vmem:[%s3858_s0 + $0x8] sm:$0xff]  ;;  %s3185_s16 = smov 126  }
   0x4   :  { %v2957_v4 = vld [vmem:[%s3858_s0 + $0x10] sm:$0xff]  ;;  %v2958_v5 = vld [vmem:[%s3858_s0 + $0x18] sm:$0xff]  ;;  %v2959_v6 = vld [vmem:[%s3858_s0 + $0x20] sm:$0xff]  ;;  %s3186_s17 = smov 2   ;;  %s3187_s1 = smov 4   ;;  %vm1867_vm1 = vcmask 15360  }
   0x5   :  { %v2980_v7 = vld [vmem:[%s3860_s2 + $0x38] sm:$0xff]  ;;  %v2960_v8 = vld [vmem:[%s3858_s0 + $0x28] sm:$0xff]  ;;  %v2979_v9 = vld [vmem:[%s3860_s2 + $0x30] sm:$0xff]  ;;  %s3189_s9 = smov 8   ;;  %s3190_s10 = smov 10   ;;  %vm1870_vm2 = vcmask 31744  }
   0x6   :  { %209 = vmatpush.bf16.msra.mxu0 %v2971_v1  ;;  %3103 = vmatpush.bf16.msra.mxu2 %v2971_v1  ;;  %v2978_v10 = vld [vmem:[%s3860_s2 + $0x28] sm:$0xff]  ;;  %v2977_v11 = vld [vmem:[%s3860_s2 + $0x20] sm:$0xff]  ;;  %v2961_v12 = vld [vmem:[%s3858_s0 + $0x30] sm:$0xff]  ;;  %s3191_s11 = smov 12   ;;  %s3192_s12 = smov 14   ;;  %vm1873_vm3 = vcmask 48128  }
   0x7   :  { %3104 = vmatpush.bf16.msra.mxu3 %v2971_v1  ;;  %425 = vmatpush.bf16.msra.mxu1 %v2980_v7  ;;  %v2967_v13 = vld [vmem:[%s3858_s0 + $0x60] sm:$0xff]  ;;  %v2976_v14 = vld [vmem:[%s3860_s2 + $0x18] sm:$0xff]  ;;  %v2975_v16 = vld [vmem:[%s3860_s2 + $0x10] sm:$0xff]  ;;  %s3193_s13 = smov 16   ;;  %s3194_s14 = smov 18   ;;  %vm1876_vm4 = vcmask 64512  }
   0x8   :  { %v2988_v15 = vld [vmem:[%s3860_s2 + $0x78] sm:$0xff]  ;;  %v2987_v17 = vld [vmem:[%s3860_s2 + $0x70] sm:$0xff]  ;;  %v2974_v18 = vld [vmem:[%s3860_s2 + $0x8] sm:$0xff]  ;;  %s3195_s15 = smov 24   ;;  %s3198_s18 = smov 26   ;;  %vm1879_vm5 = vcmask 80896  }
   0x9   :  { %2187 = vmatmul.msk.bf16.vlgmr.msra.gmra.mxu0 %vm153_vm0, %v2955_v2  ;;  %2199 = vmatmul.msk.bf16.vlgmr.msra.gmra.mxu2 %vm153_vm0, %v2967_v13  ;;  %v2986_v19 = vld [vmem:[%s3860_s2 + $0x68] sm:$0xff]  ;;  %v2973_v20 = vld [vmem:[%s3860_s2] sm:$0xff]  ;;  %v2962_v22 = vld [vmem:[%s3858_s0 + $0x38] sm:$0xff]  ;;  %s3199_s19 = smov 30   ;;  %vm1882_vm6 = vcmask 97280   ;;  %s3200_s20 = smov 28  }
   0xa   :  { %512 = vmatpush.bf16.msrb.mxu2 %v2988_v15  ;;  %v2985_v21 = vld [vmem:[%s3860_s2 + $0x60] sm:$0xff]  ;;  %v2968_v23 = vld [vmem:[%s3858_s0 + $0x68] sm:$0xff]  ;;  %v2969_v24 = vld [vmem:[%s3858_s0 + $0x70] sm:$0xff]  ;;  %s3201_s25 = smov 96   ;;  %vm1885_vm7 = vcmask 113664   ;;  %vm1888_vm8 = vcmask 130048  }
   0xb   :  { %426 = vmatpush.bf16.msra.mxu1 %v2979_v9  ;;  %v2984_v25 = vld [vmem:[%s3860_s2 + $0x58] sm:$0xff]  ;;  %2201 = vmatmul.msk.bf16.vlgmr.msra.gmra.mxu3 %vm153_vm0, %v2969_v24  ;;  %v2983_v27 = vld [vmem:[%s3860_s2 + $0x50] sm:$0xff]  ;;  %v2982_v29 = vld [vmem:[%s3860_s2 + $0x48] sm:$0xff]  ;;  %vm1891_vm9 = vcmask 146432   ;;  %vm1894_vm10 = vcmask 162816   ;;  %vm1897_vm11 = vcmask 179200  }
   0xc   :  { %v2996_v26 = vld [vmem:[%s3860_s2 + $0xb8] sm:$0xff]  ;;  %v2995_v28 = vld [vmem:[%s3860_s2 + $0xb0] sm:$0xff]  ;;  %v2994_v30 = vld [vmem:[%s3860_s2 + $0xa8] sm:$0xff]  ;;  %vm1900_vm12 = vcmask 195584   ;;  %vm1903_vm13 = vcmask 211968   ;;  %vm1906_vm14 = vcmask 228352  }
   0xd   :  { %599 = vmatpush.bf16.msrb.mxu3 %v2996_v26  ;;  %v2981_v31 = vld [vmem:[%s3860_s2 + $0x40] sm:$0xff]  ;;  %v2970_v34 = vld [vmem:[%s3858_s0 + $0x78] sm:$0xff]  ;;  %v2991_v38 = vld [vmem:[%s3860_s2 + $0x90] sm:$0xff]  ;;  %vm1909_vm15 = vcmask 244736   ;;  %s3204_s26 = smov [#allocation4]   ;;  %s3205_s29 = smov 128  }
   0xe   :  { %513 = vmatpush.bf16.msrb.mxu2 %v2987_v17  ;;  %v2993_v32 = vld [vmem:[%s3860_s2 + $0xa0] sm:$0xff]  ;;  %v2992_v36 = vld [vmem:[%s3860_s2 + $0x98] sm:$0xff]  ;;  %v3003_v39 = vld [vmem:[%s3860_s2 + $0xf0] sm:$0xff]  ;;  %s3206_s30 = smov [#allocation2]  }
   0xf   :  { %427 = vmatpush.bf16.msra.mxu1 %v2978_v10  ;;  %v2963_v33 = vld [vmem:[%s3858_s0 + $0x40] sm:$0xff]  ;;  %v3004_v37 = vld [vmem:[%s3860_s2 + $0xf8] sm:$0xff]  ;;  %v2990_v42 = vld [vmem:[%s3860_s2 + $0x88] sm:$0xff]  ;;  %s2083_s7 = sshll.u32 %s3206_s30, 4  ;;  %s2084_s7 = int_to_ptr.vmem [resolvable:$true] %s2083_s7 }
  0x10   :  { %v3002_v43 = vld [vmem:[%s3860_s2 + $0xe8] sm:$0xff]  ;;  %v2989_v47 = vld [vmem:[%s3860_s2 + $0x80] sm:$0xff]  ;;  %v3000_v54 = vld [vmem:[%s3860_s2 + $0xd8] sm:$0xff] }
  0x11   :  { %600 = vmatpush.bf16.msrb.mxu3 %v2995_v28  ;;  %v3001_v48 = vld [vmem:[%s3860_s2 + $0xe0] sm:$0xff]  ;;  %v2964_v52 = vld [vmem:[%s3858_s0 + $0x48] sm:$0xff]  ;;  %v3012_v55 = vld [vmem:[%s3860_s2 + $0x138] sm:$0xff] }
  0x12   :  { %514 = vmatpush.bf16.msrb.mxu2 %v2986_v19  ;;  %v2999_v56 = vld [vmem:[%s3860_s2 + $0xd0] sm:$0xff]  ;;  %v2998_v60 = vld [vmem:[%s3860_s2 + $0xc8] sm:$0xff]  ;;  %v2997_v1 = vld [vmem:[%s3860_s2 + $0xc0] sm:$0xff] }
  0x13   :  { %428 = vmatpush.bf16.msra.mxu1 %v2977_v11  ;;  %v3011_v57 = vld [vmem:[%s3860_s2 + $0x130] sm:$0xff]  ;;  %v3010_v61 = vld [vmem:[%s3860_s2 + $0x128] sm:$0xff]  ;;  %v3009_v2 = vld [vmem:[%s3860_s2 + $0x120] sm:$0xff] }
  0x14   :  { %v3020_v9 = vld [vmem:[%s3860_s2 + $0x178] sm:$0xff]  ;;  %v3007_v10 = vld [vmem:[%s3860_s2 + $0x110] sm:$0xff]  ;;  %v3018_v15 = vld [vmem:[%s3860_s2 + $0x168] sm:$0xff] }
  0x15   :  { %601 = vmatpush.bf16.msrb.mxu3 %v2994_v30  ;;  %v3019_v11 = vld [vmem:[%s3860_s2 + $0x170] sm:$0xff]  ;;  %v3005_v19 = vld [vmem:[%s3860_s2 + $0x100] sm:$0xff]  ;;  %v2966_v24 = vld [vmem:[%s3858_s0 + $0x58] sm:$0xff] }
  0x16   :  { %515 = vmatpush.bf16.msrb.mxu2 %v2985_v21  ;;  %v3016_v26 = vld [vmem:[%s3860_s2 + $0x158] sm:$0xff]  ;;  %v3015_v28 = vld [vmem:[%s3860_s2 + $0x150] sm:$0xff] }
  0x17   :  { %429 = vmatpush.bf16.msra.mxu1 %v2976_v14  ;;  %v3006_v14 = vld [vmem:[%s3860_s2 + $0x108] sm:$0xff] }
  0x19   :  { %2188 = vmatmul.msk.bf16.gmra.mxu0 %vm153_vm0, %v2956_v3  ;;  %2200 = vmatmul.msk.bf16.gmra.mxu2 %vm153_vm0, %v2968_v23 }
  0x1a   :  { %516 = vmatpush.bf16.msrb.mxu2 %v2984_v25  ;;  %602 = vmatpush.bf16.msrb.mxu3 %v2993_v32  ;;  %v3014_v32 = vld [vmem:[%s3860_s2 + $0x148] sm:$0xff] }
  0x1b   :  { %430 = vmatpush.bf16.msra.mxu1 %v2975_v16  ;;  %2202 = vmatmul.msk.bf16.gmra.mxu3 %vm153_vm0, %v2970_v34 }
  0x1e   :  { %517 = vmatpush.bf16.msrb.mxu2 %v2983_v27  ;;  %603 = vmatpush.bf16.msrb.mxu3 %v2992_v36  ;;  %v3028_v27 = vld [vmem:[%s3860_s2 + $0x1b8] sm:$0xff] }
  0x1f   :  { %431 = vmatpush.bf16.msra.mxu1 %v2974_v18 }
  0x22   :  { %518 = vmatpush.bf16.msrb.mxu2 %v2982_v29  ;;  %604 = vmatpush.bf16.msrb.mxu3 %v2991_v38  ;;  %v3027_v29 = vld [vmem:[%s3860_s2 + $0x1b0] sm:$0xff]  ;;  %v3025_v38 = vld [vmem:[%s3860_s2 + $0x1a0] sm:$0xff] }
  0x23   :  { %432 = vmatpush.bf16.msra.mxu1 %v2973_v20  ;;  %v3017_v20 = vld [vmem:[%s3860_s2 + $0x160] sm:$0xff] }
  0x26   :  { %519 = vmatpush.bf16.msrb.mxu2 %v2981_v31  ;;  %605 = vmatpush.bf16.msrb.mxu3 %v2990_v42 }
  0x27   :  { %686 = vmatpush.bf16.msrb.mxu1 %v3004_v37  ;;  %v3013_v37 = vld [vmem:[%s3860_s2 + $0x140] sm:$0xff] }
  0x29   :  { %2189 = vmatmul.msk.bf16.gmra.mxu0 %vm153_vm0, %v2957_v4 }
  0x2a   :  { %606 = vmatpush.bf16.msrb.mxu3 %v2989_v47  ;;  %773 = vmatpush.bf16.msra.mxu2 %v3012_v55  ;;  %v3033_v55 = vld [vmem:[%s3860_s2 + $0x1e0] sm:$0xff] }
  0x2b   :  { %687 = vmatpush.bf16.msrb.mxu1 %v3003_v39 }
  0x2e   :  { %774 = vmatpush.bf16.msra.mxu2 %v3011_v57  ;;  %860 = vmatpush.bf16.msra.mxu3 %v3020_v9  ;;  %v3050_v9 = vld [vmem:[%s3860_s2 + $0x268] sm:$0xff] }
  0x2f   :  { %688 = vmatpush.bf16.msrb.mxu1 %v3002_v43  ;;  %v3024_v43 = vld [vmem:[%s3860_s2 + $0x198] sm:$0xff] }
  0x32   :  { %775 = vmatpush.bf16.msra.mxu2 %v3010_v61  ;;  %861 = vmatpush.bf16.msra.mxu3 %v3019_v11  ;;  %v3044_v61 = vld [vmem:[%s3860_s2 + $0x238] sm:$0xff]  ;;  %v3041_v11 = vld [vmem:[%s3860_s2 + $0x220] sm:$0xff] }
  0x33   :  { %689 = vmatpush.bf16.msrb.mxu1 %v3001_v48 }
  0x36   :  { %776 = vmatpush.bf16.msra.mxu2 %v3009_v2  ;;  %862 = vmatpush.bf16.msra.mxu3 %v3018_v15  ;;  %v3051_v2 = vld [vmem:[%s3860_s2 + $0x270] sm:$0xff]  ;;  %v3049_v15 = vld [vmem:[%s3860_s2 + $0x260] sm:$0xff] }
  0x37   :  { %690 = vmatpush.bf16.msrb.mxu1 %v3000_v54  ;;  %v3021_v54 = vld [vmem:[%s3860_s2 + $0x180] sm:$0xff] }
  0x39   :  { %2190 = vmatmul.msk.bf16.gmra.mxu0 %vm153_vm0, %v2958_v5 }
  0x3a   :  { %863 = vmatpush.bf16.msra.mxu3 %v3017_v20  ;;  %v3039_v20 = vld [vmem:[%s3860_s2 + $0x210] sm:$0xff] }
  0x3b   :  { %691 = vmatpush.bf16.msrb.mxu1 %v2999_v56 }
  0x3e   :  { %864 = vmatpush.bf16.msra.mxu3 %v3016_v26 }
  0x3f   :  { %692 = vmatpush.bf16.msrb.mxu1 %v2998_v60  ;;  %v3032_v60 = vld [vmem:[%s3860_s2 + $0x1d8] sm:$0xff] }
  0x42   :  { %865 = vmatpush.bf16.msra.mxu3 %v3015_v28 }
  0x43   :  { %693 = vmatpush.bf16.msrb.mxu1 %v2997_v1 }
  0x46   :  { %866 = vmatpush.bf16.msra.mxu3 %v3014_v32 }
  0x49   :  { %2191 = vmatmul.msk.bf16.gmra.mxu0 %vm153_vm0, %v2959_v6  ;;  %v2965_v6 = vld [vmem:[%s3858_s0 + $0x50] sm:$0xff]  ;;  %s2096_s0 = sshll.u32 %s3204_s26, 4  ;;  %s2097_s0 = int_to_ptr.vmem [resolvable:$true] %s2096_s0 }
  0x4a   :  { %867 = vmatpush.bf16.msra.mxu3 %v3013_v37 }
  0x59   :  { %2192 = vmatmul.msk.bf16.gmra.mxu0 %vm153_vm0, %v2960_v8  ;;  %v3008_v8 = vld [vmem:[%s3860_s2 + $0x118] sm:$0xff] }
  0x5a   :  { %777 = vmatpush.bf16.msra.mxu2 %v3008_v8 }
  0x5e   :  { %778 = vmatpush.bf16.msra.mxu2 %v3007_v10  ;;  %v3029_v10 = vld [vmem:[%s3860_s2 + $0x1c0] sm:$0xff] }
  0x62   :  { %779 = vmatpush.bf16.msra.mxu2 %v3006_v14 }
  0x66   :  { %780 = vmatpush.bf16.msra.mxu2 %v3005_v19  ;;  %v3060_v19 = vld [vmem:[%s3860_s2 + $0x2b8] sm:$0xff] }
  0x69   :  { %2193 = vmatmul.msk.bf16.gmra.mxu0 %vm153_vm0, %v2961_v12 }
  0x79   :  { %2194 = vmatmul.msk.bf16.gmra.mxu0 %vm153_vm0, %v2962_v22 }
  0x86   :  { %v211_v35 = vpop.f32.mrf.mxu0 }
  0x87   :  { %v291_v40 = vmax.f32 %v211_v35, 0.0 }
  0x89   :  { %2195 = vmatmul.msk.bf16.gmra.mxu0 %vm153_vm0, %v2963_v33  ;;  %v323_v44 = vpack.c.bf16 %v291_v40, %v291_v40  ;;  %v3026_v33 = vld [vmem:[%s3860_s2 + $0x1a8] sm:$0xff] }
  0x8b   :  { %v373_v49 = vunpack.c.l.b16 %v323_v44  ;;  %v3036_v44 = vld [vmem:[%s3860_s2 + $0x1f8] sm:$0xff] }
  0x8e   :  { %v213_v41 = vpop.f32.mrf.mxu0 }
  0x8f   :  { %v292_v45 = vmax.f32 %v213_v41, 0.0 }
  0x91   :  { %v324_v46 = vpack.c.bf16 %v292_v45, %v292_v45  ;;  %v3023_v45 = vld [vmem:[%s3860_s2 + $0x190] sm:$0xff] }
  0x93   :  { %v374_v50 = vunpack.c.l.b16 %v324_v46  ;;  %v3035_v46 = vld [vmem:[%s3860_s2 + $0x1f0] sm:$0xff] }
  0x95   :  { %v375_v51 = vpack.c.b16 %v374_v50, %v373_v49  ;;  %v3022_v49 = vld [vmem:[%s3860_s2 + $0x188] sm:$0xff] }
  0x96   :  { %v216_v53 = vpop.f32.mrf.mxu0  ;;  %v3034_v50 = vld [vmem:[%s3860_s2 + $0x1e8] sm:$0xff] }
  0x97   :  { %433 = vmatmul.bf16.vlgmr.msra.gmra.mxu1 %v375_v51  ;;  %v293_v58 = vmax.f32 %v216_v53, 0.0 }
  0x98   :  { %947 = vmatpush.bf16.msra.mxu1 %v3028_v27 }
  0x99   :  { %2196 = vmatmul.msk.bf16.gmra.mxu0 %vm153_vm0, %v2964_v52  ;;  %v325_v62 = vpack.c.bf16 %v293_v58, %v293_v58 }
  0x9b   :  { %v460_v3 = vunpack.c.l.b16 %v325_v62  ;;  %v3052_v62 = vld [vmem:[%s3860_s2 + $0x278] sm:$0xff] }
  0x9c   :  { %948 = vmatpush.bf16.msra.mxu1 %v3027_v29  ;;  %v3046_v29 = vld [vmem:[%s3860_s2 + $0x248] sm:$0xff] }
  0x9e   :  { %v218_v59 = vpop.f32.mrf.mxu0 }
  0x9f   :  { %v294_v63 = vmax.f32 %v218_v59, 0.0 }
  0xa0   :  { %949 = vmatpush.bf16.msra.mxu1 %v3026_v33 }
  0xa1   :  { %v326_v0 = vpack.c.bf16 %v294_v63, %v294_v63  ;;  %v3031_v63 = vld [vmem:[%s3860_s2 + $0x1d0] sm:$0xff] }
  0xa3   :  { %v461_v4 = vunpack.c.l.b16 %v326_v0  ;;  %v3043_v0 = vld [vmem:[%s3860_s2 + $0x230] sm:$0xff] }
  0xa4   :  { %950 = vmatpush.bf16.msra.mxu1 %v3025_v38  ;;  %v3076_v38 = vld [vmem:[%s3860_s2 + $0x338] sm:$0xff] }
  0xa5   :  { %v462_v5 = vpack.c.b16 %v461_v4, %v460_v3  ;;  %v3030_v4 = vld [vmem:[%s3860_s2 + $0x1c8] sm:$0xff] }
  0xa6   :  { %v221_v7 = vpop.f32.mrf.mxu0 }
  0xa7   :  { %520 = vmatmul.bf16.vlgmr.msrb.gmra.mxu2 %v462_v5  ;;  %v295_v12 = vmax.f32 %v221_v7, 0.0  ;;  %v3042_v5 = vld [vmem:[%s3860_s2 + $0x228] sm:$0xff] }
  0xa8   :  { %951 = vmatpush.bf16.msra.mxu1 %v3024_v43  ;;  %1034 = vmatpush.bf16.msrb.mxu2 %v3036_v44  ;;  %v3055_v43 = vld [vmem:[%s3860_s2 + $0x290] sm:$0xff] }
  0xa9   :  { %2197 = vmatmul.msk.bf16.gmra.mxu0 %vm153_vm0, %v2965_v6  ;;  %v327_v16 = vpack.c.bf16 %v295_v12, %v295_v12  ;;  %v3067_v44 = vld [vmem:[%s3860_s2 + $0x2f0] sm:$0xff] }
  0xab   :  { %v547_v21 = vunpack.c.l.b16 %v327_v16 }
  0xac   :  { %952 = vmatpush.bf16.msra.mxu1 %v3023_v45  ;;  %1035 = vmatpush.bf16.msrb.mxu2 %v3035_v46  ;;  %v3074_v46 = vld [vmem:[%s3860_s2 + $0x328] sm:$0xff] }
  0xae   :  { %v223_v13 = vpop.f32.mrf.mxu0 }
  0xaf   :  { %v296_v17 = vmax.f32 %v223_v13, 0.0 }
  0xb0   :  { %953 = vmatpush.bf16.msra.mxu1 %v3022_v49  ;;  %1036 = vmatpush.bf16.msrb.mxu2 %v3034_v50  ;;  %v3054_v50 = vld [vmem:[%s3860_s2 + $0x288] sm:$0xff] }
  0xb1   :  { %v328_v18 = vpack.c.bf16 %v296_v17, %v296_v17  ;;  %v3040_v17 = vld [vmem:[%s3860_s2 + $0x218] sm:$0xff] }
  0xb3   :  { %v548_v22 = vunpack.c.l.b16 %v328_v18  ;;  %v3048_v18 = vld [vmem:[%s3860_s2 + $0x258] sm:$0xff] }
  0xb4   :  { %954 = vmatpush.bf16.msra.mxu1 %v3021_v54  ;;  %1037 = vmatpush.bf16.msrb.mxu2 %v3033_v55 }
  0xb5   :  { %v549_v23 = vpack.c.b16 %v548_v22, %v547_v21  ;;  %v3047_v22 = vld [vmem:[%s3860_s2 + $0x250] sm:$0xff] }
  0xb6   :  { %v226_v25 = vpop.f32.mrf.mxu0 }
  0xb7   :  { %607 = vmatmul.bf16.vlgmr.msrb.gmra.mxu3 %v549_v23  ;;  %v297_v30 = vmax.f32 %v226_v25, 0.0  ;;  %v3059_v23 = vld [vmem:[%s3860_s2 + $0x2b0] sm:$0xff]  ;;  %v3038_v25 = vld [vmem:[%s3860_s2 + $0x208] sm:$0xff] }
  0xb8   :  { %1038 = vmatpush.bf16.msrb.mxu2 %v3032_v60  ;;  %1121 = vmatpush.bf16.msrb.mxu3 %v3044_v61  ;;  %v3072_v60 = vld [vmem:[%s3860_s2 + $0x318] sm:$0xff] }
  0xb9   :  { %2198 = vmatmul.msk.bf16.gmra.mxu0 %vm153_vm0, %v2966_v24  ;;  %v329_v34 = vpack.c.bf16 %v297_v30, %v297_v30  ;;  %v3058_v30 = vld [vmem:[%s3860_s2 + $0x2a8] sm:$0xff]  ;;  %v3084_v61 = vld [vmem:[%s3860_s2 + $0x378] sm:$0xff] }
  0xbb   :  { %v634_v39 = vunpack.c.l.b16 %v329_v34 }
  0xbc   :  { %1039 = vmatpush.bf16.msrb.mxu2 %v3031_v63  ;;  %1122 = vmatpush.bf16.msrb.mxu3 %v3043_v0  ;;  %v3071_v63 = vld [vmem:[%s3860_s2 + $0x310] sm:$0xff] }
  0xbd   :  { %v3083_v0 = vld [vmem:[%s3860_s2 + $0x370] sm:$0xff] }
  0xbe   :  { %v228_v31 = vpop.f32.mrf.mxu0 }
  0xbf   :  { %v298_v35 = vmax.f32 %v228_v31, 0.0  ;;  %v3037_v31 = vld [vmem:[%s3860_s2 + $0x200] sm:$0xff] }
  0xc0   :  { %1040 = vmatpush.bf16.msrb.mxu2 %v3030_v4  ;;  %1123 = vmatpush.bf16.msrb.mxu3 %v3042_v5  ;;  %v3070_v5 = vld [vmem:[%s3860_s2 + $0x308] sm:$0xff] }
  0xc1   :  { %v330_v36 = vpack.c.bf16 %v298_v35, %v298_v35  ;;  %v3045_v35 = vld [vmem:[%s3860_s2 + $0x240] sm:$0xff] }
  0xc3   :  { %v635_v40 = vunpack.c.l.b16 %v330_v36  ;;  %v3057_v36 = vld [vmem:[%s3860_s2 + $0x2a0] sm:$0xff] }
  0xc4   :  { %1041 = vmatpush.bf16.msrb.mxu2 %v3029_v10  ;;  %1124 = vmatpush.bf16.msrb.mxu3 %v3041_v11  ;;  %v3062_v10 = vld [vmem:[%s3860_s2 + $0x2c8] sm:$0xff]  ;;  %v3631_v11 = vpop.f32.mrf.mxu3 }
  0xc5   :  { %v636_v41 = vpack.c.b16 %v635_v40, %v634_v39  ;;  %v3056_v39 = vld [vmem:[%s3860_s2 + $0x298] sm:$0xff] }
  0xc6   :  { %v231_v42 = vpop.f32.mrf.mxu0  ;;  %v3068_v40 = vld [vmem:[%s3860_s2 + $0x2f8] sm:$0xff] }
  0xc7   :  { %694 = vmatmul.bf16.vlgmr.msrb.gmra.mxu1 %v636_v41  ;;  %v299_v47 = vmax.f32 %v231_v42, 0.0  ;;  %v3075_v41 = vld [vmem:[%s3860_s2 + $0x330] sm:$0xff] }
  0xc8   :  { %1208 = vmatpush.bf16.msrb.mxu1 %v3052_v62  ;;  %1125 = vmatpush.bf16.msrb.mxu3 %v3040_v17  ;;  %v3064_v62 = vld [vmem:[%s3860_s2 + $0x2d8] sm:$0xff] }
  0xc9   :  { %v331_v51 = vpack.c.bf16 %v299_v47, %v299_v47 }
  0xcb   :  { %v721_v56 = vunpack.c.l.b16 %v331_v51  ;;  %v3066_v51 = vld [vmem:[%s3860_s2 + $0x2e8] sm:$0xff] }
  0xcc   :  { %1209 = vmatpush.bf16.msrb.mxu1 %v3051_v2  ;;  %1126 = vmatpush.bf16.msrb.mxu3 %v3039_v20 }
  0xce   :  { %v233_v48 = vpop.f32.mrf.mxu0 }
  0xcf   :  { %v300_v52 = vmax.f32 %v233_v48, 0.0 }
  0xd0   :  { %1210 = vmatpush.bf16.msrb.mxu1 %v3050_v9  ;;  %1127 = vmatpush.bf16.msrb.mxu3 %v3038_v25 }
  0xd1   :  { %v332_v53 = vpack.c.bf16 %v300_v52, %v300_v52  ;;  %v3591_v52 = vpop.f32.mrf.mxu2 }
  0xd3   :  { %v722_v57 = vunpack.c.l.b16 %v332_v53  ;;  %v3073_v53 = vld [vmem:[%s3860_s2 + $0x320] sm:$0xff] }
  0xd4   :  { %1211 = vmatpush.bf16.msrb.mxu1 %v3049_v15  ;;  %1128 = vmatpush.bf16.msrb.mxu3 %v3037_v31 }
  0xd5   :  { %v723_v58 = vpack.c.b16 %v722_v57, %v721_v56  ;;  %v3053_v57 = vld [vmem:[%s3860_s2 + $0x280] sm:$0xff] }
  0xd6   :  { %v236_v59 = vpop.f32.mrf.mxu0 }
  0xd7   :  { %781 = vmatmul.bf16.vlgmr.msra.gmra.mxu2 %v723_v58  ;;  %v301_v1 = vmax.f32 %v236_v59, 0.0  ;;  %v3065_v58 = vld [vmem:[%s3860_s2 + $0x2e0] sm:$0xff] }
  0xd8   :  { %1212 = vmatpush.bf16.msrb.mxu1 %v3048_v18  ;;  %1295 = vmatpush.bf16.msra.mxu2 %v3060_v19  ;;  %v3061_v18 = vld [vmem:[%s3860_s2 + $0x2c0] sm:$0xff] }
  0xd9   :  { %v333_v6 = vpack.c.bf16 %v301_v1, %v301_v1  ;;  %v3617_v2 = vpop.f32.mrf.mxu2 }
  0xdb   :  { %v808_v12 = vunpack.c.l.b16 %v333_v6  ;;  %v3082_v6 = vld [vmem:[%s3860_s2 + $0x368] sm:$0xff] }
  0xdc   :  { %1213 = vmatpush.bf16.msrb.mxu1 %v3047_v22  ;;  %1296 = vmatpush.bf16.msra.mxu2 %v3059_v23  ;;  %v3092_v22 = vld [vmem:[%s3860_s2 + $0x3b8] sm:$0xff]  ;;  %v3079_v23 = vld [vmem:[%s3860_s2 + $0x350] sm:$0xff] }
  0xde   :  { %v238_v3 = vpop.f32.mrf.mxu0 }
  0xdf   :  { %v302_v7 = vmax.f32 %v238_v3, 0.0  ;;  %v3063_v3 = vld [vmem:[%s3860_s2 + $0x2d0] sm:$0xff] }
  0xe0   :  { %1214 = vmatpush.bf16.msrb.mxu1 %v3046_v29  ;;  %1297 = vmatpush.bf16.msra.mxu2 %v3058_v30  ;;  %v3078_v29 = vld [vmem:[%s3860_s2 + $0x348] sm:$0xff] }
  0xe1   :  { %v334_v8 = vpack.c.bf16 %v302_v7, %v302_v7  ;;  %v3645_v20 = vpop.f32.mrf.mxu2  ;;  %v3090_v30 = vld [vmem:[%s3860_s2 + $0x3a8] sm:$0xff] }
  0xe3   :  { %v809_v13 = vunpack.c.l.b16 %v334_v8 }
  0xe4   :  { %1298 = vmatpush.bf16.msra.mxu2 %v3057_v36  ;;  %1215 = vmatpush.bf16.msrb.mxu1 %v3045_v35  ;;  %v3077_v35 = vld [vmem:[%s3860_s2 + $0x340] sm:$0xff] }
  0xe5   :  { %v810_v14 = vpack.c.b16 %v809_v13, %v808_v12  ;;  %v3069_v12 = vld [vmem:[%s3860_s2 + $0x300] sm:$0xff] }
  0xe6   :  { %v241_v16 = vpop.f32.mrf.mxu0  ;;  %v3081_v13 = vld [vmem:[%s3860_s2 + $0x360] sm:$0xff] }
  0xe7   :  { %868 = vmatmul.bf16.vlgmr.msra.gmra.mxu3 %v810_v14  ;;  %v303_v21 = vmax.f32 %v241_v16, 0.0  ;;  %v3089_v36 = vld [vmem:[%s3860_s2 + $0x3a0] sm:$0xff] }
  0xe8   :  { %1299 = vmatpush.bf16.msra.mxu2 %v3056_v39  ;;  %1382 = vmatpush.bf16.msra.mxu3 %v3068_v40  ;;  %v3100_v39 = vld [vmem:[%s3860_s2 + $0x3f8] sm:$0xff] }
  0xe9   :  { %v335_v26 = vpack.c.bf16 %v303_v21, %v303_v21  ;;  %v3080_v21 = vld [vmem:[%s3860_s2 + $0x358] sm:$0xff] }
  0xeb   :  { %v895_v32 = vunpack.c.l.b16 %v335_v26 }
  0xec   :  { %1300 = vmatpush.bf16.msra.mxu2 %v3055_v43  ;;  %1383 = vmatpush.bf16.msra.mxu3 %v3067_v44  ;;  %v3088_v43 = vld [vmem:[%s3860_s2 + $0x398] sm:$0xff]  ;;  %v3099_v44 = vld [vmem:[%s3860_s2 + $0x3f0] sm:$0xff] }
  0xee   :  { %v243_v24 = vpop.f32.mrf.mxu0 }
  0xef   :  { %v304_v27 = vmax.f32 %v243_v24, 0.0  ;;  %v3091_v24 = vld [vmem:[%s3860_s2 + $0x3b0] sm:$0xff] }
  0xf0   :  { %1301 = vmatpush.bf16.msra.mxu2 %v3054_v50  ;;  %1384 = vmatpush.bf16.msra.mxu3 %v3066_v51  ;;  %v3098_v50 = vld [vmem:[%s3860_s2 + $0x3e8] sm:$0xff] }
  0xf1   :  { %v336_v28 = vpack.c.bf16 %v304_v27, %v304_v27  ;;  %v3661_v27 = vpop.f32.mrf.mxu3 }
  0xf3   :  { %v896_v33 = vunpack.c.l.b16 %v336_v28 }
  0xf4   :  { %1385 = vmatpush.bf16.msra.mxu3 %v3065_v58  ;;  %1302 = vmatpush.bf16.msra.mxu2 %v3053_v57  ;;  %v3097_v58 = vld [vmem:[%s3860_s2 + $0x3e0] sm:$0xff] }
  0xf5   :  { %v897_v34 = vpack.c.b16 %v896_v33, %v895_v32  ;;  %v3670_v33 = vpop.f32.mrf.mxu2 }
  0xf6   :  { %v246_v37 = vpop.f32.mrf.mxu0 }
  0xf7   :  { %955 = vmatmul.bf16.vlgmr.msra.gmra.mxu1 %v897_v34  ;;  %v305_v42 = vmax.f32 %v246_v37, 0.0 }
  0xf8   :  { %1469 = vmatpush.bf16.msra.mxu1 %v3076_v38  ;;  %1386 = vmatpush.bf16.msra.mxu3 %v3064_v62  ;;  %v3085_v62 = vld [vmem:[%s3860_s2 + $0x380] sm:$0xff] }
  0xf9   :  { %v337_v47 = vpack.c.bf16 %v305_v42, %v305_v42  ;;  %v286_v42 = vpop.f32.mrf.mxu3 }
  0xfb   :  { %v982_v54 = vunpack.c.l.b16 %v337_v47 }
  0xfc   :  { %1470 = vmatpush.bf16.msra.mxu1 %v3075_v41  ;;  %1387 = vmatpush.bf16.msra.mxu3 %v3063_v3 }
  0xfe   :  { %v248_v45 = vpop.f32.mrf.mxu0 }
  0xff   :  { %v306_v48 = vmax.f32 %v248_v45, 0.0  ;;  %v315_v45 = vmax.f32 %v3591_v52, 0.0 }
 0x100   :  { %1471 = vmatpush.bf16.msra.mxu1 %v3074_v46  ;;  %1388 = vmatpush.bf16.msra.mxu3 %v3062_v10  ;;  %v316_v46 = vmax.f32 %v3617_v2, 0.0  ;;  %v3096_v2 = vld [vmem:[%s3860_s2 + $0x3d8] sm:$0xff]  ;;  %v318_v10 = vmax.f32 %v3670_v33, 0.0 }
 0x101   :  { %v338_v49 = vpack.c.bf16 %v306_v48, %v306_v48  ;;  %v3087_v48 = vld [vmem:[%s3860_s2 + $0x390] sm:$0xff]  ;;  %v347_v51 = vpack.c.bf16 %v315_v45, %v315_v45  ;;  %v288_v57 = vpop.f32.mrf.mxu3 }
 0x102   :  { %v348_v52 = vpack.c.bf16 %v316_v46, %v316_v46 }
 0x103   :  { %v983_v55 = vunpack.c.l.b16 %v338_v49 }
 0x104   :  { %1472 = vmatpush.bf16.msra.mxu1 %v3073_v53  ;;  %1389 = vmatpush.bf16.msra.mxu3 %v3061_v18  ;;  %v3086_v53 = vld [vmem:[%s3860_s2 + $0x388] sm:$0xff] }
 0x105   :  { %v984_v56 = vpack.c.b16 %v983_v55, %v982_v54  ;;  %v3094_v18 = vld [vmem:[%s3860_s2 + $0x3c8] sm:$0xff] }
 0x106   :  { %v251_v59 = vpop.f32.mrf.mxu0 }
 0x107   :  { %1042 = vmatmul.bf16.vlgmr.msrb.gmra.mxu2 %v984_v56  ;;  %v307_v1 = vmax.f32 %v251_v59, 0.0  ;;  %v1417_v59 = vunpack.c.l.b16 %v347_v51 }
 0x108   :  { %1473 = vmatpush.bf16.msra.mxu1 %v3072_v60  ;;  %1556 = vmatpush.bf16.msrb.mxu2 %v3084_v61  ;;  %v1418_v60 = vunpack.c.l.b16 %v348_v52 }
 0x109   :  { %v339_v7 = vpack.c.bf16 %v307_v1, %v307_v1 }
 0x10a   :  { %v1419_v3 = vpack.c.b16 %v1418_v60, %v1417_v59 }
 0x10b   :  { %v1069_v14 = vunpack.c.l.b16 %v339_v7  ;;  %v321_v7 = vmax.f32 %v286_v42, 0.0  ;;  %v320_v42 = vmax.f32 %v3661_v27, 0.0 }
 0x10c   :  { %1474 = vmatpush.bf16.msra.mxu1 %v3071_v63  ;;  %1557 = vmatpush.bf16.msrb.mxu2 %v3083_v0 }
 0x10e   :  { %v253_v4 = vpop.f32.mrf.mxu0 }
 0x10f   :  { %v308_v8 = vmax.f32 %v253_v4, 0.0 }
 0x110   :  { %1475 = vmatpush.bf16.msra.mxu1 %v3070_v5  ;;  %1558 = vmatpush.bf16.msrb.mxu2 %v3082_v6  ;;  %v317_v6 = vmax.f32 %v3645_v20, 0.0 }
 0x111   :  { %v340_v9 = vpack.c.bf16 %v308_v8, %v308_v8  ;;  %v322_v8 = vmax.f32 %v288_v57, 0.0 }
 0x113   :  { %v1070_v15 = vunpack.c.l.b16 %v340_v9  ;;  %v3095_v9 = vld [vmem:[%s3860_s2 + $0x3d0] sm:$0xff] }
 0x114   :  { %v3639_v16 = vpop.f32.mrf.mxu1  ;;  %1476 = vmatpush.bf16.msra.mxu1 %v3069_v12  ;;  %1559 = vmatpush.bf16.msrb.mxu2 %v3081_v13 }
 0x115   :  { %v1071_v17 = vpack.c.b16 %v1070_v15, %v1069_v14  ;;  %1919 = vrot.lane.b32.xlu0 %v3639_v16, %s3185_s16  ;;  %v349_v14 = vpack.c.bf16 %v317_v6, %v317_v6  ;;  %v353_v15 = vpack.c.bf16 %v321_v7, %v321_v7 }
 0x116   :  { %v256_v19 = vpop.f32.mrf.mxu0 }
 0x117   :  { %1129 = vmatmul.bf16.vlgmr.msrb.gmra.mxu3 %v1071_v17  ;;  %v309_v25 = vmax.f32 %v256_v19, 0.0  ;;  %v354_v17 = vpack.c.bf16 %v322_v8, %v322_v8  ;;  %v350_v19 = vpack.c.bf16 %v318_v10, %v318_v10 }
 0x118   :  { %1643 = vmatpush.bf16.msrb.mxu3 %v3092_v22  ;;  %1560 = vmatpush.bf16.msrb.mxu2 %v3080_v21 }
 0x119   :  { %v341_v31 = vpack.c.bf16 %v309_v25, %v309_v25  ;;  %v1679_v25 = vunpack.c.l.b16 %v354_v17 }
 0x11b   :  { %v1156_v37 = vunpack.c.l.b16 %v341_v31 }
 0x11c   :  { %v3659_v26 = vpop.f32.mrf.mxu1  ;;  %1644 = vmatpush.bf16.msrb.mxu3 %v3091_v24  ;;  %1561 = vmatpush.bf16.msrb.mxu2 %v3079_v23  ;;  %v1504_v23 = vunpack.c.l.b16 %v349_v14  ;;  %v1678_v24 = vunpack.c.l.b16 %v353_v15 }
 0x11d   :  { %1921 = vrot.lane.b32.xlu1 %v3659_v26, %s3185_s16  ;;  %s3196_s16 = smov 20  }
 0x11e   :  { %v258_v28 = vpop.f32.mrf.mxu0 }
 0x11f   :  { %v310_v32 = vmax.f32 %v258_v28, 0.0  ;;  %v3093_v28 = vld [vmem:[%s3860_s2 + $0x3c0] sm:$0xff]  ;;  %s3188_s2 = smov 6  }
 0x120   :  { %1645 = vmatpush.bf16.msrb.mxu3 %v3090_v30  ;;  %1562 = vmatpush.bf16.msrb.mxu2 %v3078_v29  ;;  %v1505_v29 = vunpack.c.l.b16 %v350_v19 }
 0x121   :  { %v342_v34 = vpack.c.bf16 %v310_v32, %v310_v32 }
 0x123   :  { %v1157_v38 = vunpack.c.l.b16 %v342_v34 }
 0x124   :  { %1646 = vmatpush.bf16.msrb.mxu3 %v3089_v36  ;;  %1563 = vmatpush.bf16.msrb.mxu2 %v3077_v35  ;;  %v1680_v36 = vpack.c.b16 %v1679_v25, %v1678_v24 }
 0x125   :  { %v1158_v40 = vpack.c.b16 %v1157_v38, %v1156_v37  ;;  %v1506_v38 = vpack.c.b16 %v1505_v29, %v1504_v23 }
 0x126   :  { %v261_v41 = vpop.f32.mrf.mxu0 }
 0x127   :  { %1216 = vmatmul.bf16.vlgmr.msrb.gmra.mxu1 %v1158_v40  ;;  %v311_v49 = vmax.f32 %v261_v41, 0.0  ;;  %v319_v41 = vmax.f32 %v3631_v11, 0.0 }
 0x128   :  { %1730 = vmatpush.bf16.msrb.mxu1 %v3100_v39  ;;  %1647 = vmatpush.bf16.msrb.mxu3 %v3088_v43 }
 0x129   :  { %v343_v55 = vpack.c.bf16 %v311_v49, %v311_v49  ;;  %v351_v46 = vpack.c.bf16 %v319_v41, %v319_v41 }
 0x12a   :  { %v3689_v47 = vpop.f32.mrf.mxu2 }
 0x12b   :  { %1749 = vrot.lane.b32.xlu0 %v3689_v47, %s3186_s17  ;;  %v1243_v0 = vunpack.c.l.b16 %v343_v55  ;;  %v526_v30 = vadd.f32 %v3689_v47, %v3639_v16 }
 0x12c   :  { %1731 = vmatpush.bf16.msrb.mxu1 %v3099_v44  ;;  %1648 = vmatpush.bf16.msrb.mxu3 %v3087_v48  ;;  %v352_v48 = vpack.c.bf16 %v320_v42, %v320_v42 }
 0x12e   :  { %v263_v54 = vpop.f32.mrf.mxu0  ;;  %v1592_v51 = vunpack.c.l.b16 %v352_v48 }
 0x12f   :  { %v312_v56 = vmax.f32 %v263_v54, 0.0 }
 0x130   :  { %1732 = vmatpush.bf16.msrb.mxu1 %v3098_v50  ;;  %1649 = vmatpush.bf16.msrb.mxu3 %v3086_v53  ;;  %v1591_v50 = vunpack.c.l.b16 %v351_v46 }
 0x131   :  { %v344_v61 = vpack.c.bf16 %v312_v56, %v312_v56 }
 0x132   :  { %v3708_v63 = vpop.f32.mrf.mxu2  ;;  %v1593_v52 = vpack.c.b16 %v1592_v51, %v1591_v50 }
 0x133   :  { %v1244_v1 = vunpack.c.l.b16 %v344_v61  ;;  %1751 = vrot.lane.b32.xlu0 %v3708_v63, %s3186_s17  ;;  %v527_v43 = vadd.f32 %v3708_v63, %v3659_v26 }
 0x134   :  { %1733 = vmatpush.bf16.msrb.mxu1 %v3097_v58  ;;  %1650 = vmatpush.bf16.msrb.mxu3 %v3085_v62 }
 0x135   :  { %v1245_v4 = vpack.c.b16 %v1244_v1, %v1243_v0 }
 0x136   :  { %v266_v5 = vpop.f32.mrf.mxu0 }
 0x137   :  { %1303 = vmatmul.bf16.vlgmr.msra.gmra.mxu2 %v1245_v4  ;;  %1477 = vmatmul.bf16.vlgmr.msra.gmra.mxu1 %v1419_v3  ;;  %v313_v12 = vmax.f32 %v266_v5, 0.0 }
 0x138   :  { %1734 = vmatpush.bf16.msrb.mxu1 %v3096_v2 }
 0x139   :  { %v345_v20 = vpack.c.bf16 %v313_v12, %v313_v12 }
 0x13a   :  { %v608_v13 = vpop.f32.mrf.mxu3 }
 0x13b   :  { %1925 = vrot.lane.b32.xlu2 %v608_v13, %s3186_s17  ;;  %1757 = vrot.lane.b32.xlu1 %v608_v13, %s3187_s1  ;;  %v1330_v31 = vunpack.c.l.b16 %v345_v20  ;;  %v613_v34 = vadd.f32 %v608_v13, %v526_v30 }
 0x13c   :  { %1735 = vmatpush.bf16.msrb.mxu1 %v3095_v9 }
 0x13e   :  { %v268_v21 = vpop.f32.mrf.mxu0 }
 0x13f   :  { %v314_v22 = vmax.f32 %v268_v21, 0.0 }
 0x140   :  { %1736 = vmatpush.bf16.msrb.mxu1 %v3094_v18 }
 0x141   :  { %v346_v32 = vpack.c.bf16 %v314_v22, %v314_v22 }
 0x142   :  { %v610_v33 = vpop.f32.mrf.mxu3 }
 0x143   :  { %v1331_v35 = vunpack.c.l.b16 %v346_v32  ;;  %1927 = vrot.lane.b32.xlu0 %v610_v33, %s3186_s17  ;;  %1759 = vrot.lane.b32.xlu1 %v610_v33, %s3187_s1  ;;  %v614_v44 = vadd.f32 %v610_v33, %v527_v43  ;;  %s3197_s17 = smov 22  }
 0x144   :  { %v695_v37 = vpop.f32.mrf.mxu1  ;;  %1737 = vmatpush.bf16.msrb.mxu1 %v3093_v28 }
 0x145   :  { %v1332_v39 = vpack.c.b16 %v1331_v35, %v1330_v31  ;;  %v700_v40 = vadd.f32 %v695_v37, %v613_v34  ;;  %1765 = vrot.lane.b32.xlu2 %v695_v37, %s3188_s2 }
 0x147   :  { %1390 = vmatmul.bf16.vlgmr.msra.gmra.mxu3 %v1332_v39  ;;  %1564 = vmatmul.bf16.vlgmr.msrb.gmra.mxu2 %v1506_v38 }
 0x148   :  { %1738 = vmatmul.bf16.vlgmr.msrb.gmra.mxu1 %v1680_v36 }
 0x14b   :  { %1931 = vrot.lane.b32.xlu1 %v695_v37, %s3187_s1 }
 0x14c   :  { %v697_v45 = vpop.f32.mrf.mxu1 }
 0x14d   :  { %v701_v49 = vadd.f32 %v697_v45, %v614_v44  ;;  %1767 = vrot.lane.b32.xlu2 %v697_v45, %s3188_s2 }
 0x155   :  { %1933 = vrot.lane.b32.xlu2 %v697_v45, %s3187_s1 }
 0x157   :  { %1651 = vmatmul.bf16.vlgmr.msrb.gmra.mxu3 %v1593_v52 }
 0x15a   :  { %v782_v11 = vpop.f32.mrf.mxu2 }
 0x15b   :  { %v787_v53 = vadd.f32 %v782_v11, %v700_v40  ;;  %1773 = vrot.lane.b32.xlu0 %v782_v11, %s3189_s9 }
 0x162   :  { %v784_v27 = vpop.f32.mrf.mxu2 }
 0x163   :  { %v788_v54 = vadd.f32 %v784_v27, %v701_v49  ;;  %1937 = vrot.lane.b32.xlu0 %v782_v11, %s3188_s2  ;;  %1775 = vrot.lane.b32.xlu1 %v784_v27, %s3189_s9 }
 0x16a   :  { %v869_v55 = vpop.f32.mrf.mxu3 }
 0x16b   :  { %v874_v56 = vadd.f32 %v869_v55, %v787_v53  ;;  %1939 = vrot.lane.b32.xlu1 %v784_v27, %s3188_s2  ;;  %1781 = vrot.lane.b32.xlu2 %v869_v55, %s3190_s10 }
 0x172   :  { %v871_v57 = vpop.f32.mrf.mxu3 }
 0x173   :  { %v875_v58 = vadd.f32 %v871_v57, %v788_v54  ;;  %1943 = vrot.lane.b32.xlu2 %v869_v55, %s3189_s9  ;;  %1783 = vrot.lane.b32.xlu0 %v871_v57, %s3190_s10 }
 0x174   :  { %v956_v59 = vpop.f32.mrf.mxu1 }
 0x175   :  { %v961_v60 = vadd.f32 %v956_v59, %v874_v56  ;;  %1789 = vrot.lane.b32.xlu1 %v956_v59, %s3191_s11 }
 0x17b   :  { %1945 = vrot.lane.b32.xlu0 %v871_v57, %s3189_s9 }
 0x17c   :  { %v958_v61 = vpop.f32.mrf.mxu1 }
 0x17d   :  { %v962_v62 = vadd.f32 %v958_v61, %v875_v58  ;;  %1949 = vrot.lane.b32.xlu1 %v956_v59, %s3190_s10  ;;  %1791 = vrot.lane.b32.xlu2 %v958_v61, %s3191_s11 }
 0x185   :  { %1951 = vrot.lane.b32.xlu2 %v958_v61, %s3190_s10  ;;  %s2085_s10 = sshll.u32 %s3863_s5, 4  ;;  %s2086_s10 = int_to_ptr.hbm [resolvable:$true] %s2085_s10 }
 0x187   :  { %v1920_v2 = vpop.permute.xlu0 %1919 }
 0x188   :  { %v2009_v5 = vsel %vm1867_vm1, %v1920_v2, %v3689_v47 }
 0x18a   :  { %v1043_v0 = vpop.f32.mrf.mxu2 }
 0x18b   :  { %v1048_v1 = vadd.f32 %v1043_v0, %v961_v60  ;;  %1797 = vrot.lane.b32.xlu0 %v1043_v0, %s3192_s12 }
 0x18f   :  { %v1922_v47 = vpop.permute.xlu1 %1921 }
 0x190   :  { %v2010_v29 = vsel %vm1867_vm1, %v1922_v47, %v3708_v63 }
 0x192   :  { %v1045_v3 = vpop.f32.mrf.mxu2 }
 0x193   :  { %v1049_v4 = vadd.f32 %v1045_v3, %v962_v62  ;;  %1955 = vrot.lane.b32.xlu0 %v1043_v0, %s3191_s11  ;;  %1799 = vrot.lane.b32.xlu1 %v1045_v3, %s3192_s12 }
 0x195   :  { %v1926_v6 = vpop.permute.xlu2 %1925 }
 0x196   :  { %v2011_v7 = vsel %vm1870_vm2, %v2009_v5, %v1926_v6 }
 0x19a   :  { %v1130_v8 = vpop.f32.mrf.mxu3 }
 0x19b   :  { %v1135_v9 = vadd.f32 %v1130_v8, %v1048_v1  ;;  %1957 = vrot.lane.b32.xlu1 %v1045_v3, %s3191_s11  ;;  %1805 = vrot.lane.b32.xlu2 %v1130_v8, %s3193_s13 }
 0x19d   :  { %v1750_v10 = vpop.permute.xlu0 %1749 }
 0x19e   :  { %v1868_v12 = vsel %vm1867_vm1, %v3639_v16, %v1750_v10 }
 0x19f   :  { %v1766_v13 = vpop.permute.xlu2 %1765 }
 0x1a2   :  { %v1132_v14 = vpop.f32.mrf.mxu3 }
 0x1a3   :  { %v1136_v15 = vadd.f32 %v1132_v14, %v1049_v4  ;;  %1961 = vrot.lane.b32.xlu2 %v1130_v8, %s3192_s12  ;;  %1807 = vrot.lane.b32.xlu0 %v1132_v14, %s3193_s13 }
 0x1a4   :  { %v1217_v17 = vpop.f32.mrf.mxu1 }
 0x1a5   :  { %v1222_v18 = vadd.f32 %v1217_v17, %v1135_v9  ;;  %v1752_v19 = vpop.permute.xlu0 %1751  ;;  %1813 = vrot.lane.b32.xlu1 %v1217_v17, %s3194_s14 }
 0x1a6   :  { %v1869_v20 = vsel %vm1867_vm1, %v3659_v26, %v1752_v19  ;;  %vm2058_vm1 = vcmask 523264  }
 0x1a7   :  { %v1768_v21 = vpop.permute.xlu2 %1767 }
 0x1ab   :  { %1963 = vrot.lane.b32.xlu0 %v1132_v14, %s3192_s12 }
 0x1ac   :  { %v1219_v16 = vpop.f32.mrf.mxu1 }
 0x1ad   :  { %v1223_v22 = vadd.f32 %v1219_v16, %v1136_v15  ;;  %v1758_v23 = vpop.permute.xlu1 %1757  ;;  %1967 = vrot.lane.b32.xlu1 %v1217_v17, %s3193_s13  ;;  %1815 = vrot.lane.b32.xlu2 %v1219_v16, %s3194_s14 }
 0x1ae   :  { %v1871_v24 = vsel %vm1870_vm2, %v1868_v12, %v1758_v23 }
 0x1af   :  { %v1874_v25 = vsel %vm1873_vm3, %v1871_v24, %v1766_v13  ;;  %v1934_v31 = vpop.permute.xlu2 %1933 }
 0x1b4   :  { %v1478_v28 = vpop.f32.mrf.mxu1 }
 0x1b5   :  { %v1928_v30 = vpop.permute.xlu0 %1927  ;;  %v1760_v26 = vpop.permute.xlu1 %1759  ;;  %1969 = vrot.lane.b32.xlu2 %v1219_v16, %s3193_s13  ;;  %1837 = vrot.lane.b32.xlu1 %v1478_v28, %s3195_s15 }
 0x1b6   :  { %v2012_v32 = vsel %vm1870_vm2, %v2010_v29, %v1928_v30  ;;  %v1872_v33 = vsel %vm1870_vm2, %v1869_v20, %v1760_v26 }
 0x1b7   :  { %v1875_v34 = vsel %vm1873_vm3, %v1872_v33, %v1768_v21  ;;  %v2014_v35 = vsel %vm1873_vm3, %v2012_v32, %v1934_v31  ;;  %v3127_v21 = vld [vmem:[%s3862_s4] ss:$0 sm:$0xff]  ;;  %s3203_s4 = smov 32  }
 0x1ba   :  { %v1304_v36 = vpop.f32.mrf.mxu2 }
 0x1bb   :  { %v1309_v37 = vadd.f32 %v1304_v36, %v1222_v18  ;;  %1821 = vrot.lane.b32.xlu0 %v1304_v36, %s3196_s16 }
 0x1bc   :  { %v1480_v63 = vpop.f32.mrf.mxu1 }
 0x1bd   :  { %v1932_v38 = vpop.permute.xlu1 %1931  ;;  %1985 = vrot.lane.b32.xlu1 %v1478_v28, %s3197_s17  ;;  %1839 = vrot.lane.b32.xlu2 %v1480_v63, %s3195_s15 }
 0x1be   :  { %v2013_v39 = vsel %vm1873_vm3, %v2011_v7, %v1932_v38 }
 0x1c2   :  { %v1306_v40 = vpop.f32.mrf.mxu2 }
 0x1c3   :  { %v1310_v41 = vadd.f32 %v1306_v40, %v1223_v22  ;;  %1973 = vrot.lane.b32.xlu0 %v1304_v36, %s3194_s14  ;;  %v3805_v22 = vld [vmem:[%s3861_s3] ss:$0 sm:$0xff]  ;;  %s3202_s3 = smov 124  }
 0x1c5   :  { %1987 = vrot.lane.b32.xlu2 %v1480_v63, %s3197_s17  ;;  %1823 = vrot.lane.b32.xlu1 %v1306_v40, %s3196_s16  ;;  %v1782_v45 = vpop.permute.xlu2 %1781  ;;  %v1739_v52 = vpop.f32.mrf.mxu1 }
 0x1ca   :  { %v1391_v42 = vpop.f32.mrf.mxu3  ;;  %v1565_v43 = vpop.f32.mrf.mxu2 }
 0x1cb   :  { %v1396_v44 = vadd.f32 %v1391_v42, %v1309_v37  ;;  %1845 = vrot.lane.b32.xlu0 %v1565_v43, %s3198_s18 }
 0x1cd   :  { %v1483_v46 = vadd.f32 %v1478_v28, %v1396_v44  ;;  %v1774_v48 = vpop.permute.xlu0 %1773  ;;  %1975 = vrot.lane.b32.xlu1 %v1306_v40, %s3194_s14  ;;  %1829 = vrot.lane.b32.xlu2 %v1391_v42, %s3197_s17  ;;  %v1944_v56 = vpop.permute.xlu2 %1943 }
 0x1ce   :  { %v1877_v49 = vsel %vm1876_vm4, %v1874_v25, %v1774_v48  ;;  %v1741_v0 = vpop.f32.mrf.mxu1 }
 0x1cf   :  { %v1570_v50 = vadd.f32 %v1565_v43, %v1483_v46  ;;  %v1880_v51 = vsel %vm1879_vm5, %v1877_v49, %v1782_v45 }
 0x1d2   :  { %v1393_v11 = vpop.f32.mrf.mxu3  ;;  %v1567_v57 = vpop.f32.mrf.mxu2 }
 0x1d3   :  { %v1397_v53 = vadd.f32 %v1393_v11, %v1310_v41  ;;  %1991 = vrot.lane.b32.xlu0 %v1565_v43, %s3195_s15 }
 0x1d5   :  { %v1484_v27 = vadd.f32 %v1480_v63, %v1397_v53  ;;  %v1938_v54 = vpop.permute.xlu0 %1937  ;;  %v1776_v55 = vpop.permute.xlu1 %1775  ;;  %1861 = vrot.lane.b32.xlu1 %v1739_v52, %s3199_s19  ;;  %1979 = vrot.lane.b32.xlu2 %v1391_v42, %s3196_s16 }
 0x1d6   :  { %v2015_v58 = vsel %vm1876_vm4, %v2013_v39, %v1938_v54  ;;  %v1878_v59 = vsel %vm1876_vm4, %v1875_v34, %v1776_v55 }
 0x1d7   :  { %v1571_v60 = vadd.f32 %v1567_v57, %v1484_v27  ;;  %v2017_v61 = vsel %vm1879_vm5, %v2015_v58, %v1944_v56  ;;  %v1792_v6 = vpop.permute.xlu2 %1791 }
 0x1da   :  { %v1652_v62 = vpop.f32.mrf.mxu3 }
 0x1db   :  { %v1657_v1 = vadd.f32 %v1652_v62, %v1570_v50  ;;  %1831 = vrot.lane.b32.xlu0 %v1393_v11, %s3197_s17 }
 0x1dd   :  { %v1940_v2 = vpop.permute.xlu1 %1939  ;;  %1847 = vrot.lane.b32.xlu1 %v1567_v57, %s3198_s18  ;;  %1863 = vrot.lane.b32.xlu2 %v1741_v0, %s3199_s19  ;;  %v3783_v3 = vadd.f32 %v1739_v52, %v1657_v1 }
 0x1de   :  { %v2016_v4 = vsel %vm1876_vm4, %v2014_v35, %v1940_v2 }
 0x1df   :  { %v1952_v15 = vpop.permute.xlu2 %1951 }
 0x1e2   :  { %v1654_v5 = vpop.f32.mrf.mxu3 }
 0x1e3   :  { %v1658_v7 = vadd.f32 %v1654_v5, %v1571_v60  ;;  %1981 = vrot.lane.b32.xlu0 %v1393_v11, %s3196_s16 }
 0x1e5   :  { %v1784_v8 = vpop.permute.xlu0 %1783  ;;  %1993 = vrot.lane.b32.xlu1 %v1567_v57, %s3195_s15  ;;  %1853 = vrot.lane.b32.xlu2 %v1652_v62, %s3200_s20  ;;  %v3788_v9 = vadd.f32 %v1741_v0, %v1658_v7 }
 0x1e6   :  { %v1881_v10 = vsel %vm1879_vm5, %v1878_v59, %v1784_v8 }
 0x1e7   :  { %v1790_v12 = vpop.permute.xlu1 %1789  ;;  %v1884_v13 = vsel %vm1882_vm6, %v1881_v10, %v1792_v6 }
 0x1e8   :  { %v1883_v14 = vsel %vm1882_vm6, %v1880_v51, %v1790_v12 }
 0x1eb   :  { %1855 = vrot.lane.b32.xlu0 %v1654_v5, %s3200_s20 }
 0x1ed   :  { %v1946_v17 = vpop.permute.xlu0 %1945  ;;  %2003 = vrot.lane.b32.xlu1 %v1739_v52, %s3200_s20  ;;  %1997 = vrot.lane.b32.xlu2 %v1652_v62, %s3198_s18 }
 0x1ee   :  { %v2018_v47 = vsel %vm1879_vm5, %v2016_v4, %v1946_v17 }
 0x1ef   :  { %v1950_v18 = vpop.permute.xlu1 %1949  ;;  %v2020_v19 = vsel %vm1882_vm6, %v2018_v47, %v1952_v15 }
 0x1f0   :  { %v2019_v20 = vsel %vm1882_vm6, %v2017_v61, %v1950_v18 }
 0x1f3   :  { %1999 = vrot.lane.b32.xlu0 %v1654_v5, %s3198_s18 }
 0x1f5   :  { %v1806_v16 = vpop.permute.xlu2 %1805  ;;  %2064 = vrot.lane.b32.xlu1 %v3127_v21, %s3187_s1  ;;  %2005 = vrot.lane.b32.xlu2 %v1741_v0, %s3200_s20  ;;  %s2098_s1 = sshll.u32 %s3864_s6, 4  ;;  %s2099_s1 = int_to_ptr.hbm [resolvable:$true] %s2098_s1 }
 0x1fb   :  { %2039 = vrot.lane.b32.xlu0 %v3805_v22, %s3201_s25 }
 0x1fd   :  { %v1798_v23 = vpop.permute.xlu0 %1797  ;;  %v1962_v25 = vpop.permute.xlu2 %1961 }
 0x1fe   :  { %v1886_v24 = vsel %vm1885_vm7, %v1883_v14, %v1798_v23 }
 0x1ff   :  { %v1889_v28 = vsel %vm1888_vm8, %v1886_v24, %v1806_v16 }
 0x205   :  { %v1956_v29 = vpop.permute.xlu0 %1955  ;;  %v1800_v30 = vpop.permute.xlu1 %1799 }
 0x206   :  { %v2021_v26 = vsel %vm1885_vm7, %v2019_v20, %v1956_v29  ;;  %v1887_v31 = vsel %vm1885_vm7, %v1884_v13, %v1800_v30 }
 0x207   :  { %v1816_v32 = vpop.permute.xlu2 %1815  ;;  %v2023_v33 = vsel %vm1888_vm8, %v2021_v26, %v1962_v25 }
 0x20d   :  { %v1958_v34 = vpop.permute.xlu1 %1957 }
 0x20e   :  { %v2022_v35 = vsel %vm1885_vm7, %v2020_v19, %v1958_v34 }
 0x20f   :  { %v1970_v36 = vpop.permute.xlu2 %1969 }
 0x215   :  { %v1808_v37 = vpop.permute.xlu0 %1807 }
 0x216   :  { %v1890_v63 = vsel %vm1888_vm8, %v1887_v31, %v1808_v37 }
 0x217   :  { %v1814_v38 = vpop.permute.xlu1 %1813  ;;  %v1840_v39 = vpop.permute.xlu2 %1839  ;;  %v1893_v40 = vsel %vm1891_vm9, %v1890_v63, %v1816_v32 }
 0x218   :  { %v1892_v41 = vsel %vm1891_vm9, %v1889_v28, %v1814_v38 }
 0x21d   :  { %v1964_v42 = vpop.permute.xlu0 %1963 }
 0x21e   :  { %v2024_v43 = vsel %vm1888_vm8, %v2022_v35, %v1964_v42 }
 0x21f   :  { %v1968_v44 = vpop.permute.xlu1 %1967  ;;  %v1988_v45 = vpop.permute.xlu2 %1987  ;;  %v2026_v47 = vsel %vm1891_vm9, %v2024_v43, %v1970_v36 }
 0x220   :  { %v2025_v46 = vsel %vm1891_vm9, %v2023_v33, %v1968_v44 }
 0x227   :  { %v1838_v48 = vpop.permute.xlu1 %1837  ;;  %v1830_v49 = vpop.permute.xlu2 %1829 }
 0x22d   :  { %v1822_v50 = vpop.permute.xlu0 %1821 }
 0x22e   :  { %v1895_v51 = vsel %vm1894_vm10, %v1892_v41, %v1822_v50 }
 0x22f   :  { %v1898_v52 = vsel %vm1897_vm11, %v1895_v51, %v1830_v49  ;;  %v1986_v11 = vpop.permute.xlu1 %1985  ;;  %v1980_v53 = vpop.permute.xlu2 %1979 }
 0x230   :  { %v1901_v27 = vsel %vm1900_vm12, %v1898_v52, %v1838_v48 }
 0x235   :  { %v1974_v54 = vpop.permute.xlu0 %1973 }
 0x236   :  { %v2027_v18 = vsel %vm1894_vm10, %v2025_v46, %v1974_v54 }
 0x237   :  { %v1824_v55 = vpop.permute.xlu1 %1823  ;;  %v1864_v56 = vpop.permute.xlu2 %1863  ;;  %v2029_v16 = vsel %vm1897_vm11, %v2027_v18, %v1980_v53 }
 0x238   :  { %v1896_v57 = vsel %vm1894_vm10, %v1893_v40, %v1824_v55  ;;  %v2031_v28 = vsel %vm1900_vm12, %v2029_v16, %v1986_v11 }
 0x23d   :  { %v1846_v58 = vpop.permute.xlu0 %1845 }
 0x23e   :  { %v1904_v59 = vsel %vm1903_vm13, %v1901_v27, %v1846_v58 }
 0x23f   :  { %v1976_v60 = vpop.permute.xlu1 %1975  ;;  %v1854_v61 = vpop.permute.xlu2 %1853 }
 0x240   :  { %v1907_v62 = vsel %vm1906_vm14, %v1904_v59, %v1854_v61  ;;  %v2028_v19 = vsel %vm1894_vm10, %v2026_v47, %v1976_v60 }
 0x245   :  { %v1992_v0 = vpop.permute.xlu0 %1991 }
 0x246   :  { %v2033_v30 = vsel %vm1903_vm13, %v2031_v28, %v1992_v0 }
 0x247   :  { %v1862_v1 = vpop.permute.xlu1 %1861  ;;  %v1998_v20 = vpop.permute.xlu2 %1997 }
 0x248   :  { %v1910_v2 = vsel %vm1909_vm15, %v1907_v62, %v1862_v1  ;;  %v2035_v32 = vsel %vm1906_vm14, %v2033_v30, %v1998_v20 }
 0x249   :  { %v1915_v42 = vadd.f32 %v3805_v22, %v1910_v2 }
 0x24d   :  { %v1832_v4 = vpop.permute.xlu0 %1831 }
 0x24e   :  { %v1899_v5 = vsel %vm1897_vm11, %v1896_v57, %v1832_v4 }
 0x24f   :  { %v1848_v6 = vpop.permute.xlu1 %1847  ;;  %v1902_v7 = vsel %vm1900_vm12, %v1899_v5, %v1840_v39  ;;  %v2006_v33 = vpop.permute.xlu2 %2005 }
 0x250   :  { %v1905_v8 = vsel %vm1903_vm13, %v1902_v7, %v1848_v6 }
 0x255   :  { %v1982_v10 = vpop.permute.xlu0 %1981 }
 0x256   :  { %v2030_v21 = vsel %vm1897_vm11, %v2028_v19, %v1982_v10 }
 0x257   :  { %v1994_v12 = vpop.permute.xlu1 %1993  ;;  %v2032_v24 = vsel %vm1900_vm12, %v2030_v21, %v1988_v45 }
 0x258   :  { %v2034_v26 = vsel %vm1903_vm13, %v2032_v24, %v1994_v12 }
 0x25d   :  { %v1856_v13 = vpop.permute.xlu0 %1855 }
 0x25e   :  { %v1908_v14 = vsel %vm1906_vm14, %v1905_v8, %v1856_v13 }
 0x25f   :  { %v1911_v15 = vsel %vm1909_vm15, %v1908_v14, %v1864_v56  ;;  %v2004_v17 = vpop.permute.xlu1 %2003 }
 0x260   :  { %v2037_v34 = vsel %vm1909_vm15, %v2035_v32, %v2004_v17  ;;  %v1916_v46 = vadd.f32 %v3805_v22, %v1911_v15 }
 0x265   :  { %v2000_v23 = vpop.permute.xlu0 %1999 }
 0x266   :  { %v2036_v31 = vsel %vm1906_vm14, %v2034_v26, %v2000_v23 }
 0x267   :  { %v2065_v25 = vpop.permute.xlu1 %2064  ;;  %v2038_v35 = vsel %vm1909_vm15, %v2036_v31, %v2006_v33 }
 0x268   :  { %v2067_v29 = vadd.f32 %v2065_v25, %v3783_v3  ;;  %v2068_v41 = vadd.f32 %v2065_v25, %v3788_v9 }
 0x26a   :  { %2071 = vrot.lane.b32.xlu1 %v2067_v29, %s3202_s3 }
 0x26d   :  { %v2040_v36 = vpop.permute.xlu0 %2039 }
 0x26e   :  { %v2042_v37 = vadd.f32 %v2040_v36, %v2037_v34  ;;  %v2043_v63 = vadd.f32 %v2040_v36, %v2038_v35 }
 0x270   :  { %v2044_v38 = vmul.f32 1.442695, %v2042_v37  ;;  %v2046_v3 = vmul.f32 1.442695, %v2043_v63 }
 0x272   :  { %3129 = vpow2.f32 %v2044_v38 }
 0x273   :  { %3131 = vpow2.f32 %v2046_v3 }
 0x278   :  { %v3130_v39 = vpop.eup %3129 }
 0x279   :  { %v3132_v40 = vpop.eup %3131  ;;  %2050 = vrot.lane.b32.xlu2 %v3130_v39, %s3203_s4 }
 0x27a   :  { %2052 = vrot.lane.b32.xlu0 %v3132_v40, %s3203_s4 }
 0x281   :  { %2073 = vrot.lane.b32.xlu2 %v2068_v41, %s3202_s3 }
 0x2d3   :  { %v2051_v43 = vpop.permute.xlu2 %2050 }
 0x2d4   :  { %v2056_v44 = vsel %vm153_vm0, %v1915_v42, %v2051_v43 }
 0x2d5   :  { %2059 = vst.msk [vmem:[#allocation2] sm:$0xff] %vm2058_vm1, %v2056_v44 }
 0x2db   :  { %v2074_v45 = vpop.permute.xlu2 %2073 }
 0x2dc   :  { %2078 = vst.msk [vmem:[#allocation4 + $0x8] sm:$0xff] %vm1879_vm5, %v2074_v45  ;;  %v2072_v9 = vpop.permute.xlu1 %2071 }
 0x2dd   :  { %2077 = vst.msk [vmem:[#allocation4] sm:$0xff] %vm1879_vm5, %v2072_v9 }
 0x2de   :  { %2104 = dma.vmem_to_hbm [thread:$0]  %s2097_s0, 256, %s2099_s1, [#allocation5], %s3205_s29, %s3205_s29, %s3189_s9  }
 0x2ec   :  { %v2053_v48 = vpop.permute.xlu0 %2052 }
 0x2ed   :  { %v2057_v49 = vsel %vm153_vm0, %v1916_v46, %v2053_v48 }
 0x2ee   :  { %2060 = vst.msk [vmem:[#allocation2 + $0x8] sm:$0xff] %vm2058_vm1, %v2057_v49 }
 0x2ef   :  { %2091 = dma.vmem_to_hbm [thread:$0]  %s2084_s7, 256, %s2086_s10, [#allocation3], %s3205_s29, %s3205_s29, %s3189_s9  }
 0x2f0   :  { %3181 = dma.done.wait [#allocation3], 256  }
 0x2f1   :  { %3182 = vsyncadd [#allocation3], 4294967040 }
 0x2f2   :  { %3183 = dma.done.wait [#allocation5], 256  }
 0x2f3   :  { %3184 = vsyncadd [#allocation5], 4294967040 }
 0x2f4   :  { %2113 = vsyncpa [#allocation3], 1 }
 0x2f5   :  { %2114 = vsyncpa [#allocation5], 1 }

</bundles_post_ra>
